<compile_context>
chip_gen: v7x
topology: tpu7x:2x2x1
jax: 0.10.0
libtpu: 0.0.40
codegen_flags: <defaults>
</compile_context>

<pallas_src>
import functools

import jax
import jax.numpy as jnp
from jax.experimental import pallas as pl
from jax.experimental.pallas import tpu as pltpu

Z_PRIVATE = 3
Z_SHARED = 5
IN_DIM = 784
IN_PAD = 896                       # 7 * 128, lane-dense K for fc1
HID = 512
OUT_DIM = 2 * Z_PRIVATE + 2 * Z_SHARED   # 16
OUT_PAD = 128                      # lane-dense stats width


def _round_up(x, m):
    return ((x + m - 1) // m) * m


def encoder_kernel(x_ref, w1_ref, b1_ref, w2_ref, b2_ref, w3_ref, b3_ref,
                   out_ref):
    """One batch tile: fc1 -> swish -> fc2 -> swish -> fc3 -> [stats | std]."""
    # fc1 + swish (bf16 operands, f32 accumulation on the MXU)
    x = x_ref[...].astype(jnp.bfloat16)
    h = jnp.dot(x, w1_ref[...], preferred_element_type=jnp.float32)
    h = h + b1_ref[...]
    h = h * jax.nn.sigmoid(h)
    # fc2 + swish
    h = jnp.dot(h.astype(jnp.bfloat16), w2_ref[...],
                preferred_element_type=jnp.float32)
    h = h + b2_ref[...]
    h = h * jax.nn.sigmoid(h)
    # fc3 (padded to 128 output lanes; pad columns of w3/b3 are zero)
    s = jnp.dot(h.astype(jnp.bfloat16), w3_ref[...],
                preferred_element_type=jnp.float32)
    s = s + b3_ref[...]
    # Single lane-dense output slab: stats in lanes [0,128), std in [128,256).
    # std = sqrt(exp(logvar)) == exp(0.5*logvar); computed for every column,
    # the wrapper slices out the genuine logvar columns.
    out_ref[:, :OUT_PAD] = s
    out_ref[:, OUT_PAD:] = jnp.exp(0.5 * s)


def prepare_params(params, weight_dtype=jnp.bfloat16):
    """Pad + cast raw [in, out] params into kernel layout (do this once)."""
    w1, b1, w2, b2, w3, b3 = params
    w1 = jnp.pad(w1, ((0, IN_PAD - IN_DIM), (0, 0))).astype(weight_dtype)
    w2 = w2.astype(weight_dtype)
    w3 = jnp.pad(w3, ((0, 0), (0, OUT_PAD - OUT_DIM))).astype(weight_dtype)
    b1 = b1.reshape(1, HID).astype(jnp.float32)
    b2 = b2.reshape(1, HID).astype(jnp.float32)
    b3 = jnp.pad(b3.reshape(1, OUT_DIM),
                 ((0, 0), (0, OUT_PAD - OUT_DIM))).astype(jnp.float32)
    return (w1, b1, w2, b2, w3, b3)


def encoder_a_forward(x, prepped_params, *, block_b=256):
    """x: [..., 784] (e.g. [B,1,28,28]) float32.  Returns the 6-tuple of
    EncoderA.forward: (muP, stdP, logvarP, muS, stdS, logvarS)."""
    assert block_b % 8 == 0
    w1, b1, w2, b2, w3, b3 = prepped_params

    x = x.reshape(-1, IN_DIM)                     # mirrors x.view(-1, 784)
    B = x.shape[0]
    TB = min(block_b, _round_up(B, 8))            # batch tile (multiple of 8)
    Bp = _round_up(B, TB)                         # padded batch (no partial tiles)
    xp = jnp.pad(x, ((0, Bp - B), (0, IN_PAD - IN_DIM)))

    grid = (Bp // TB,)
    const2d = lambda i: (0, 0)                    # weights: VMEM-resident

    flops = 2 * Bp * (IN_PAD * HID + HID * HID + HID * OUT_PAD)
    transcendentals = Bp * (2 * HID + OUT_PAD)    # 2 sigmoids per row + exp
    bytes_accessed = (xp.size * 4 + w1.size * 2 + w2.size * 2 + w3.size * 2
                      + (b1.size + b2.size + b3.size) * 4
                      + Bp * 2 * OUT_PAD * 4)

    out = pl.pallas_call(
        encoder_kernel,
        out_shape=jax.ShapeDtypeStruct((Bp, 2 * OUT_PAD), jnp.float32),
        grid_spec=pltpu.PrefetchScalarGridSpec(
            num_scalar_prefetch=0,
            grid=grid,
            in_specs=[
                pl.BlockSpec((TB, IN_PAD), lambda i: (i, 0)),   # x tile
                pl.BlockSpec((IN_PAD, HID), const2d),           # w1 (resident)
                pl.BlockSpec((1, HID), const2d),                # b1
                pl.BlockSpec((HID, HID), const2d),              # w2
                pl.BlockSpec((1, HID), const2d),                # b2
                pl.BlockSpec((HID, OUT_PAD), const2d),          # w3
                pl.BlockSpec((1, OUT_PAD), const2d),            # b3
            ],
            out_specs=pl.BlockSpec((TB, 2 * OUT_PAD), lambda i: (i, 0)),
        ),
        compiler_params=pltpu.CompilerParams(
            dimension_semantics=("parallel",)),    # megacore on v7x
        cost_estimate=pl.CostEstimate(
            flops=flops,
            transcendentals=transcendentals,
            bytes_accessed=bytes_accessed),
    )(xp, w1, b1, w2, b2, w3, b3)

    stats = out[:B, :OUT_DIM]
    std = out[:B, OUT_PAD:OUT_PAD + OUT_DIM]

    zp, zs = Z_PRIVATE, Z_SHARED
    muPrivate = stats[:, :zp]
    logvarPrivate = stats[:, zp:2 * zp]
    stdPrivate = std[:, zp:2 * zp]
    muShared = stats[:, 2 * zp:2 * zp + zs]
    logvarShared = stats[:, 2 * zp + zs:2 * (zp + zs)]
    stdShared = std[:, 2 * zp + zs:2 * (zp + zs)]
    return (muPrivate, stdPrivate, logvarPrivate,
            muShared, stdShared, logvarShared)


def init_params(key):
    """Deterministic parameter init (uniform, nn.Linear-style bounds),
    stored as [in, out]."""
    ks = jax.random.split(key, 6)

    def linear(kw, kb, fan_in, fan_out):
        bound = 1.0 / jnp.sqrt(fan_in)
        w = jax.random.uniform(kw, (fan_in, fan_out), jnp.float32,
                               minval=-bound, maxval=bound)
        b = jax.random.uniform(kb, (1, fan_out), jnp.float32,
                               minval=-bound, maxval=bound)
        return w, b

    w1, b1 = linear(ks[0], ks[1], IN_DIM, HID)
    w2, b2 = linear(ks[2], ks[3], HID, HID)
    w3, b3 = linear(ks[4], ks[5], HID, OUT_DIM)
    return (w1, b1, w2, b2, w3, b3)


def reference_forward(x, params, cast_dtype=None):
    """Pure-JAX EncoderA.forward.  cast_dtype=jnp.bfloat16 mirrors the
    kernel's weight/activation quantization (f32 accumulation) exactly."""
    w1, b1, w2, b2, w3, b3 = params
    x = x.reshape(-1, IN_DIM)
    c = (lambda a: a.astype(cast_dtype)) if cast_dtype is not None else (lambda a: a)
    dot = lambda a, b: jnp.dot(c(a), c(b), preferred_element_type=jnp.float32)
    swish = lambda h: h * jax.nn.sigmoid(h)
    h = swish(dot(x, w1) + b1)
    h = swish(dot(h, w2) + b2)
    stats = dot(h, w3) + b3
    zp, zs = Z_PRIVATE, Z_SHARED
    muP = stats[:, :zp]
    lvP = stats[:, zp:2 * zp]
    stdP = jnp.sqrt(jnp.exp(lvP))
    muS = stats[:, 2 * zp:2 * zp + zs]
    lvS = stats[:, 2 * zp + zs:]
    stdS = jnp.sqrt(jnp.exp(lvS))
    return (muP, stdP, lvP, muS, stdS, lvS)


if __name__ == "__main__":
    key = jax.random.PRNGKey(0)
    k_param, k_x = jax.random.split(key)
    params = init_params(k_param)
    prepped = prepare_params(params)          # bf16 weights, padded, done once

    B = 16
    # MNIST-style input; the wrapper reshapes to (-1, 784) like x.view(-1, 784).
    x = jax.random.normal(k_x, (B, 1, 28, 28), dtype=jnp.float32)

    # block_b=8 so the small test batch still exercises a multi-step grid
    # (weights stay VMEM-resident across the 2 grid steps).
    fwd = jax.jit(functools.partial(encoder_a_forward, block_b=8))
    outs = jax.block_until_ready(fwd(x, prepped))

    # (a) exact check vs a reference using the same bf16 quantization
    refs_q = reference_forward(x, params, cast_dtype=jnp.bfloat16)
    # (b) loose check vs the full-f32 PyTorch-semantics reference
    #     (difference = bf16 weight/activation quantization only)
    refs_f32 = reference_forward(x, params)

    for o, rq, rf in zip(outs, refs_q, refs_f32):
        assert o.shape == rq.shape
        err_q = float(jnp.max(jnp.abs(o - rq)))
        err_f = float(jnp.max(jnp.abs(o - rf)))
        assert err_q < 1e-3, f"kernel vs bf16 reference mismatch: {err_q}"
        assert err_f < 5e-2, f"kernel vs f32 reference mismatch: {err_f}"

    print("KERNEL_OK")
</pallas_src>

<mosaic_0001>
module attributes {stable_mosaic.version = 11 : i64} {
  func.func @encoder_kernel(%arg0: i32, %arg1: memref<8x896xf32, #tpu.memory_space<vmem>>, %arg2: memref<896x512xbf16, #tpu.memory_space<vmem>>, %arg3: memref<1x512xf32, #tpu.memory_space<vmem>>, %arg4: memref<512x512xbf16, #tpu.memory_space<vmem>>, %arg5: memref<1x512xf32, #tpu.memory_space<vmem>>, %arg6: memref<512x128xbf16, #tpu.memory_space<vmem>>, %arg7: memref<1x128xf32, #tpu.memory_space<vmem>>, %arg8: memref<8x256xf32, #tpu.memory_space<vmem>>) attributes {dimension_semantics = [#tpu.dimension_semantics<parallel>], iteration_bounds = array<i64: 2>, scalar_prefetch = 0 : i64, scratch_operands = 0 : i64, tpu.core_type = #tpu.core_type<tc>, window_params = [{transform_indices = @transform_0, window_bounds = array<i64: 8, 896>}, {pipeline_mode = #tpu.pipeline_mode<synchronous>, transform_indices = @transform_1, window_bounds = array<i64: 896, 512>}, {pipeline_mode = #tpu.pipeline_mode<synchronous>, transform_indices = @transform_2, window_bounds = array<i64: 1, 512>}, {pipeline_mode = #tpu.pipeline_mode<synchronous>, transform_indices = @transform_3, window_bounds = array<i64: 512, 512>}, {pipeline_mode = #tpu.pipeline_mode<synchronous>, transform_indices = @transform_4, window_bounds = array<i64: 1, 512>}, {pipeline_mode = #tpu.pipeline_mode<synchronous>, transform_indices = @transform_5, window_bounds = array<i64: 512, 128>}, {pipeline_mode = #tpu.pipeline_mode<synchronous>, transform_indices = @transform_6, window_bounds = array<i64: 1, 128>}, {transform_indices = @transform_7, window_bounds = array<i64: 8, 256>}]} {
    %c0 = arith.constant 0 : index
    %c0_0 = arith.constant 0 : index
    %0 = vector.load %arg1[%c0, %c0_0] : memref<8x896xf32, #tpu.memory_space<vmem>>, vector<8x896xf32>
    %1 = arith.truncf %0 : vector<8x896xf32> to vector<8x896xbf16>
    %c0_1 = arith.constant 0 : index
    %c0_2 = arith.constant 0 : index
    %2 = vector.load %arg2[%c0_1, %c0_2] : memref<896x512xbf16, #tpu.memory_space<vmem>>, vector<896x512xbf16>
    %cst = arith.constant dense<0.000000e+00> : vector<8x512xf32>
    %3 = tpu.matmul %1, %2, %cst {dimension_numbers = #tpu.dot_dimension_numbers<[1], [0], [0], [1], [0, 0, 1, 1], [], []>} : vector<8x896xbf16>, vector<896x512xbf16>, vector<8x512xf32> -> vector<8x512xf32>
    %c0_3 = arith.constant 0 : index
    %c0_4 = arith.constant 0 : index
    %4 = vector.load %arg3[%c0_3, %c0_4] : memref<1x512xf32, #tpu.memory_space<vmem>>, vector<1x512xf32>
    %5 = vector.broadcast %4 : vector<1x512xf32> to vector<8x512xf32>
    %6 = arith.addf %3, %5 : vector<8x512xf32>
    %7 = arith.negf %6 : vector<8x512xf32>
    %8 = math.exp %7 : vector<8x512xf32>
    %cst_5 = arith.constant 1.000000e+00 : f32
    %9 = vector.broadcast %cst_5 : f32 to vector<8x512xf32>
    %10 = arith.addf %9, %8 : vector<8x512xf32>
    %11 = arith.divf %9, %10 : vector<8x512xf32>
    %12 = arith.mulf %6, %11 : vector<8x512xf32>
    %13 = arith.truncf %12 : vector<8x512xf32> to vector<8x512xbf16>
    %c0_6 = arith.constant 0 : index
    %c0_7 = arith.constant 0 : index
    %14 = vector.load %arg4[%c0_6, %c0_7] : memref<512x512xbf16, #tpu.memory_space<vmem>>, vector<512x512xbf16>
    %cst_8 = arith.constant dense<0.000000e+00> : vector<8x512xf32>
    %15 = tpu.matmul %13, %14, %cst_8 {dimension_numbers = #tpu.dot_dimension_numbers<[1], [0], [0], [1], [0, 0, 1, 1], [], []>} : vector<8x512xbf16>, vector<512x512xbf16>, vector<8x512xf32> -> vector<8x512xf32>
    %c0_9 = arith.constant 0 : index
    %c0_10 = arith.constant 0 : index
    %16 = vector.load %arg5[%c0_9, %c0_10] : memref<1x512xf32, #tpu.memory_space<vmem>>, vector<1x512xf32>
    %17 = vector.broadcast %16 : vector<1x512xf32> to vector<8x512xf32>
    %18 = arith.addf %15, %17 : vector<8x512xf32>
    %19 = arith.negf %18 : vector<8x512xf32>
    %20 = math.exp %19 : vector<8x512xf32>
    %cst_11 = arith.constant 1.000000e+00 : f32
    %21 = vector.broadcast %cst_11 : f32 to vector<8x512xf32>
    %22 = arith.addf %21, %20 : vector<8x512xf32>
    %23 = arith.divf %21, %22 : vector<8x512xf32>
    %24 = arith.mulf %18, %23 : vector<8x512xf32>
    %25 = arith.truncf %24 : vector<8x512xf32> to vector<8x512xbf16>
    %c0_12 = arith.constant 0 : index
    %c0_13 = arith.constant 0 : index
    %26 = vector.load %arg6[%c0_12, %c0_13] : memref<512x128xbf16, #tpu.memory_space<vmem>>, vector<512x128xbf16>
    %cst_14 = arith.constant dense<0.000000e+00> : vector<8x128xf32>
    %27 = tpu.matmul %25, %26, %cst_14 {dimension_numbers = #tpu.dot_dimension_numbers<[1], [0], [0], [1], [0, 0, 1, 1], [], []>} : vector<8x512xbf16>, vector<512x128xbf16>, vector<8x128xf32> -> vector<8x128xf32>
    %c0_15 = arith.constant 0 : index
    %c0_16 = arith.constant 0 : index
    %28 = vector.load %arg7[%c0_15, %c0_16] : memref<1x128xf32, #tpu.memory_space<vmem>>, vector<1x128xf32>
    %29 = vector.broadcast %28 : vector<1x128xf32> to vector<8x128xf32>
    %30 = arith.addf %27, %29 : vector<8x128xf32>
    %c0_17 = arith.constant 0 : index
    %c0_18 = arith.constant 0 : index
    %31 = vector.load %arg8[%c0_17, %c0_18] : memref<8x256xf32, #tpu.memory_space<vmem>>, vector<8x128xf32>
    tpu.vector_store %arg8[%c0_17, %c0_18], %30 {strides = array<i32>} : memref<8x256xf32, #tpu.memory_space<vmem>>, vector<8x128xf32>,
    %cst_19 = arith.constant 5.000000e-01 : f32
    %32 = vector.broadcast %cst_19 : f32 to vector<8x128xf32>
    %33 = arith.mulf %32, %30 : vector<8x128xf32>
    %34 = math.exp %33 : vector<8x128xf32>
    %c0_20 = arith.constant 0 : index
    %c128 = arith.constant 128 : index
    %35 = vector.load %arg8[%c0_20, %c128] : memref<8x256xf32, #tpu.memory_space<vmem>>, vector<8x128xf32>
    tpu.vector_store %arg8[%c0_20, %c128], %34 {strides = array<i32>} : memref<8x256xf32, #tpu.memory_space<vmem>>, vector<8x128xf32>,
    return
  }
  func.func @transform_0(%arg0: i32) -> (i32, i32) {
    %c0_i32 = arith.constant 0 : i32
    %c0_i32_0 = arith.constant 0 : i32
    return %arg0, %c0_i32 : i32, i32
  }
  func.func @transform_1(%arg0: i32) -> (i32, i32) {
    %c0_i32 = arith.constant 0 : i32
    %c0_i32_0 = arith.constant 0 : i32
    %c0_i32_1 = arith.constant 0 : i32
    return %c0_i32, %c0_i32_0 : i32, i32
  }
  func.func @transform_2(%arg0: i32) -> (i32, i32) {
    %c0_i32 = arith.constant 0 : i32
    %c0_i32_0 = arith.constant 0 : i32
    %c0_i32_1 = arith.constant 0 : i32
    return %c0_i32, %c0_i32_0 : i32, i32
  }
  func.func @transform_3(%arg0: i32) -> (i32, i32) {
    %c0_i32 = arith.constant 0 : i32
    %c0_i32_0 = arith.constant 0 : i32
    %c0_i32_1 = arith.constant 0 : i32
    return %c0_i32, %c0_i32_0 : i32, i32
  }
  func.func @transform_4(%arg0: i32) -> (i32, i32) {
    %c0_i32 = arith.constant 0 : i32
    %c0_i32_0 = arith.constant 0 : i32
    %c0_i32_1 = arith.constant 0 : i32
    return %c0_i32, %c0_i32_0 : i32, i32
  }
  func.func @transform_5(%arg0: i32) -> (i32, i32) {
    %c0_i32 = arith.constant 0 : i32
    %c0_i32_0 = arith.constant 0 : i32
    %c0_i32_1 = arith.constant 0 : i32
    return %c0_i32, %c0_i32_0 : i32, i32
  }
  func.func @transform_6(%arg0: i32) -> (i32, i32) {
    %c0_i32 = arith.constant 0 : i32
    %c0_i32_0 = arith.constant 0 : i32
    %c0_i32_1 = arith.constant 0 : i32
    return %c0_i32, %c0_i32_0 : i32, i32
  }
  func.func @transform_7(%arg0: i32) -> (i32, i32) {
    %c0_i32 = arith.constant 0 : i32
    %c0_i32_0 = arith.constant 0 : i32
    return %arg0, %c0_i32 : i32, i32
  }
}

</mosaic_0001>

<bundles_post_ra>
// kernel: encoder_a_forward.1
= control target key start
LH: loop header
LB: loop body
LE: loop exit
PB: predicated region body
PF: predicated region fallthrough
CT: control target
= control target key end

     0   :  { %12 = vsyncpa [#allocation3], 0  ;;  %s5523_s0 = inlined_call_operand.vmem [shape: f32[16,896], index: 0, kind: input, shape index: {}]   ;;  %s5524_s1 = inlined_call_operand.vmem [shape: bf16[896,512], index: 1, kind: input, shape index: {}]   ;;  %s5525_s2 = inlined_call_operand.vmem [shape: f32[1,512], index: 2, kind: input, shape index: {}]   ;;  %s5526_s3 = inlined_call_operand.hbm [shape: bf16[512,512], index: 3, kind: input, shape index: {}]   ;;  %s5527_s4 = inlined_call_operand.vmem [shape: f32[1,512], index: 4, kind: input, shape index: {}]   ;;  %s5528_s5 = inlined_call_operand.hbm [shape: bf16[512,128], index: 5, kind: input, shape index: {}]   ;;  %s5529_s6 = inlined_call_operand.vmem [shape: f32[1,128], index: 6, kind: input, shape index: {}]   ;;  %s5530_s7 = inlined_call_operand.vmem [shape: f32[16,256], index: 7, kind: output, shape index: {}]  }
   0x1   :  { %13 = vsyncpa [#allocation5], 0  ;;  %s4701_s24 = smov 0  }
   0x2 LB: > { %s4654_s25 = smov [#allocation2]   ;;  %s4707_s27 = sadd.s32 4294967295, %s4652_s24   ;;  %s4652_s24 = sphi %s4701_s24, %s19_s24  }
   0x3   : > { %s220_s26 = sshll.u32 %s4654_s25, 4  ;;  %p3463_p0 = scmp.ge.s32.totalorder %s4652_s24, 1  ;;  %s221_s26 = int_to_ptr.vmem [resolvable:$true] %s220_s26 }
   0x4   : > { %p202_p1 = scmp.lt.s32.totalorder %s4652_s24, 3  ;;  %p5531_p3 = scmp.eq.s32.totalorder %s4707_s27, 0 }
   0x5   : > { %s4655_s29 = smov [#allocation4]   ;;  %s4582_s11 = scalar_lea.hbm %s5526_s3, 16384 }
   0x6   : > { %p4711_p2 = pnand %p3463_p0, %p202_p1  ;;  %s236_s30 = sshll.u32 %s4655_s29, 4  ;;  %s4724_s30 = int_to_ptr.vmem [resolvable:$true] %s236_s30 }
   0x7   : > { %p4583_p6 = scmp.ne.s32.totalorder %s5526_s3, %s4582_s11  ;;  %p4589_p10 = scmp.lt.u32.totalorder %s4582_s11, %s5526_s3 }
   0x8   : > { %s5533_s28 = scalar_select %p4711_p2, 1, 0 }
   0x9   : > { %p3962_p4 = pneg %p4711_p2 }
   0xb   : > { %p4720_p5 = pnand %p5531_p3, %p3962_p4 }
   0xd   : > { %p4584_p7 = pneg %p4720_p5 }
   0xf   : > { %p4585_p8 = pnand %p4584_p7, %p4583_p6 }
  0x11   : > { %p4586_p9 = pneg %p4585_p8 }
  0x13   : > { %p4591_p11 = pnand %p4589_p10, %p4586_p9 }
  0x15   : > { %4594 = shalt.err (!%p4591_p11)
}
  0x16   : > { %s4595_s16 = scalar_lea.vmem %s221_s26, 16384  ;;  %p4603_p1 = scmp.lt.s32.totalorder %s221_s26, %s221_s26 }
  0x17   : > { %p4596_p12 = scmp.ne.s32.totalorder %s221_s26, %s4595_s16  ;;  %p4604_p4 = scmp.lt.s32.totalorder %s4595_s16, %s4595_s16 }
  0x19   : > { %p4598_p13 = pnand %p4596_p12, %p4584_p7  ;;  %p4605_p3 = por %p4604_p4, %p4603_p1 }
  0x1b   : > { %p4599_p0 = pneg %p4598_p13 }
  0x1d   : > { %p4606_p2 = pnand %p4605_p3, %p4599_p0 }
  0x1f   : > { %4609 = shalt.err (!%p4606_p2)
}
  0x20   : > { %s4656_s17 = smov 256   ;;  %s4657_s18 = smov 16  }
  0x21   : > { %3965 = dma.hbm_to_vmem [thread:$0]  (!%p4720_p5), %s5526_s3, 16384, %s221_s26, [#allocation3], %s4656_s17, %s4656_s17, %s4657_s18  }
  0x22   : > { %s4610_s23 = scalar_lea.hbm %s5528_s5, 4096 }
  0x23   : > { %p4611_p6 = scmp.ne.s32.totalorder %s5528_s5, %s4610_s23  ;;  %p4617_p8 = scmp.lt.u32.totalorder %s4610_s23, %s5528_s5 }
  0x25   : > { %p4613_p2 = pnand %p4611_p6, %p4584_p7 }
  0x27   : > { %p4614_p3 = pneg %p4613_p2 }
  0x29   : > { %p4619_p9 = pnand %p4617_p8, %p4614_p3 }
  0x2b   : > { %4622 = shalt.err (!%p4619_p9)
}
  0x2c   : > { %s4623_s26 = scalar_lea.vmem %s4724_s30, 4096  ;;  %p4631_p13 = scmp.lt.s32.totalorder %s4724_s30, %s4724_s30 }
  0x2d   : > { %p4624_p10 = scmp.ne.s32.totalorder %s4724_s30, %s4623_s26  ;;  %p4632_p0 = scmp.lt.s32.totalorder %s4623_s26, %s4623_s26 }
  0x2f   : > { %p4626_p11 = pnand %p4624_p10, %p4584_p7  ;;  %p4633_p1 = por %p4632_p0, %p4631_p13 }
  0x31   : > { %p4627_p12 = pneg %p4626_p11 }
  0x33   : > { %p4634_p4 = pnand %p4633_p1, %p4627_p12 }
  0x35   : > { %4637 = shalt.err (!%p4634_p4)
}
  0x36   : > { %s4658_s11 = smov 64   ;;  %s4659_s12 = smov 4  }
  0x37   : > { %3968 = dma.hbm_to_vmem [thread:$0]  (!%p4720_p5), %s5528_s5, 4096, %s4724_s30, [#allocation5], %s4658_s11, %s4658_s11, %s4659_s12  }
  0x38   : > { %p5535_p6 = scmp.ne.s32.totalorder %s5533_s28, 0 }
  0x39   : > { %p5536_p7 = scmp.eq.s32.totalorder (!%p5535_p6), %s4707_s27, 0 }
  0x3a   : > { %263 = sbr.rel (%p5535_p6) target bundleno = 1087 (0x43f), region = 48 }
  0x41   : > { %4643 = dma.done.wait (%p5536_p7), [#allocation3], 16384   ;;  %p5537_p2 = pmov %p5536_p7 }
  0x43   : > { %4645 = vsyncadd (%p5537_p2), [#allocation3], 4294950912  ;;  %p5538_p3 = pmov %p5537_p2 }
  0x44   : > { %p5539_p8 = pmov %p5537_p2 }
  0x45   : > { %4647 = dma.done.wait (%p5538_p3), [#allocation5], 4096  }
  0x46   : > { %4649 = vsyncadd (%p5539_p8), [#allocation5], 4294963200  ;;  %v3988_v0 = vld [vmem:[%s5524_s1 + $0x4] ss:$16 sps:$4 sm:$0xff]   ;;  %v3990_v1 = vld [vmem:[%s5524_s1 + $0xc] ss:$16 sps:$4 sm:$0xff]  }
  0x47   : > { %1690 = vmatprep.subr.bf16.mxu0 %v3988_v0  ;;  %v3992_v2 = vld [vmem:[%s5524_s1] ss:$16 sps:$4 sm:$0xff]   ;;  %v3993_v3 = vld [vmem:[%s5524_s1 + $0x8] ss:$16 sps:$4 sm:$0xff]   ;;  %1854 = vmatprep.subr.bf16.mxu1 %v3990_v1  ;;  %v3994_v4 = vld [vmem:[%s5524_s1 + $0x24] ss:$16 sps:$4 sm:$0xff]  }
  0x48   : > { %1691 = vmatpush1.bf16.msra.mxu0 %v3992_v2  ;;  %1855 = vmatpush1.bf16.msra.mxu1 %v3993_v3  ;;  %v3996_v5 = vld [vmem:[%s5524_s1 + $0x2c] ss:$16 sps:$4 sm:$0xff]   ;;  %v3998_v6 = vld [vmem:[%s5524_s1 + $0x20] ss:$16 sps:$4 sm:$0xff]   ;;  %v3999_v7 = vld [vmem:[%s5524_s1 + $0x28] ss:$16 sps:$4 sm:$0xff]  }
  0x49   : > { %1692 = vmatprep.subr.bf16.mxu0 %v3994_v4  ;;  %1856 = vmatprep.subr.bf16.mxu1 %v3996_v5  ;;  %v4000_v8 = vld [vmem:[%s5524_s1 + $0x44] ss:$16 sps:$4 sm:$0xff]   ;;  %v4002_v9 = vld [vmem:[%s5524_s1 + $0x4c] ss:$16 sps:$4 sm:$0xff]   ;;  %v4004_v10 = vld [vmem:[%s5524_s1 + $0x40] ss:$16 sps:$4 sm:$0xff]  }
  0x4a   : > { %v4005_v11 = vld [vmem:[%s5524_s1 + $0x48] ss:$16 sps:$4 sm:$0xff]   ;;  %v4006_v12 = vld [vmem:[%s5524_s1 + $0x64] ss:$16 sps:$4 sm:$0xff]   ;;  %v4008_v13 = vld [vmem:[%s5524_s1 + $0x6c] ss:$16 sps:$4 sm:$0xff]  }
  0x4b   : > { %v4010_v14 = vld [vmem:[%s5524_s1 + $0x60] ss:$16 sps:$4 sm:$0xff]   ;;  %v4011_v15 = vld [vmem:[%s5524_s1 + $0x68] ss:$16 sps:$4 sm:$0xff]   ;;  %v4012_v16 = vld [vmem:[%s5524_s1 + $0x84] ss:$16 sps:$4 sm:$0xff]  }
  0x4c   : > { %1693 = vmatpush1.bf16.msra.mxu0 %v3998_v6  ;;  %1857 = vmatpush1.bf16.msra.mxu1 %v3999_v7  ;;  %v4014_v17 = vld [vmem:[%s5524_s1 + $0x8c] ss:$16 sps:$4 sm:$0xff]   ;;  %v4016_v18 = vld [vmem:[%s5524_s1 + $0x80] ss:$16 sps:$4 sm:$0xff]   ;;  %v4017_v19 = vld [vmem:[%s5524_s1 + $0x88] ss:$16 sps:$4 sm:$0xff]  }
  0x4d   : > { %1694 = vmatprep.subr.bf16.mxu0 %v4000_v8  ;;  %1858 = vmatprep.subr.bf16.mxu1 %v4002_v9  ;;  %v4018_v20 = vld [vmem:[%s5524_s1 + $0xa4] ss:$16 sps:$4 sm:$0xff]   ;;  %v4020_v21 = vld [vmem:[%s5524_s1 + $0xac] ss:$16 sps:$4 sm:$0xff]   ;;  %v4022_v22 = vld [vmem:[%s5524_s1 + $0xa0] ss:$16 sps:$4 sm:$0xff]  }
  0x4e   : > { %v4023_v23 = vld [vmem:[%s5524_s1 + $0xa8] ss:$16 sps:$4 sm:$0xff]   ;;  %v4024_v24 = vld [vmem:[%s5524_s1 + $0xc4] ss:$16 sps:$4 sm:$0xff]   ;;  %v4026_v25 = vld [vmem:[%s5524_s1 + $0xcc] ss:$16 sps:$4 sm:$0xff]  }
  0x4f   : > { %v4028_v26 = vld [vmem:[%s5524_s1 + $0xc0] ss:$16 sps:$4 sm:$0xff]   ;;  %v4029_v27 = vld [vmem:[%s5524_s1 + $0xc8] ss:$16 sps:$4 sm:$0xff]   ;;  %v4030_v28 = vld [vmem:[%s5524_s1 + $0xe4] ss:$16 sps:$4 sm:$0xff]  }
  0x50   : > { %1695 = vmatpush1.bf16.msra.mxu0 %v4004_v10  ;;  %1859 = vmatpush1.bf16.msra.mxu1 %v4005_v11  ;;  %v4032_v29 = vld [vmem:[%s5524_s1 + $0xec] ss:$16 sps:$4 sm:$0xff]   ;;  %v4034_v30 = vld [vmem:[%s5524_s1 + $0xe0] ss:$16 sps:$4 sm:$0xff]   ;;  %p299_p5 = scmp.lt.s32.totalorder %s4707_s27, 1 }
  0x51   : > { %1696 = vmatprep.subr.bf16.mxu0 %v4006_v12  ;;  %1860 = vmatprep.subr.bf16.mxu1 %v4008_v13  ;;  %v4035_v31 = vld [vmem:[%s5524_s1 + $0xe8] ss:$16 sps:$4 sm:$0xff]   ;;  %v4036_v32 = vld [vmem:[%s5524_s1 + $0x104] ss:$16 sps:$4 sm:$0xff]   ;;  %v4038_v33 = vld [vmem:[%s5524_s1 + $0x10c] ss:$16 sps:$4 sm:$0xff]  }
  0x52   : > { %v4040_v34 = vld [vmem:[%s5524_s1 + $0x100] ss:$16 sps:$4 sm:$0xff]   ;;  %v4041_v35 = vld [vmem:[%s5524_s1 + $0x108] ss:$16 sps:$4 sm:$0xff]   ;;  %s5541_s27 = smov (!%p299_p5, %s4707_s27), 1 }
  0x53   : > { %v4042_v36 = vld [vmem:[%s5524_s1 + $0x124] ss:$16 sps:$4 sm:$0xff]   ;;  %v4044_v37 = vld [vmem:[%s5524_s1 + $0x12c] ss:$16 sps:$4 sm:$0xff]   ;;  %v4046_v38 = vld [vmem:[%s5524_s1 + $0x120] ss:$16 sps:$4 sm:$0xff]  }
  0x54   : > { %1697 = vmatpush1.bf16.msra.mxu0 %v4010_v14  ;;  %1861 = vmatpush1.bf16.msra.mxu1 %v4011_v15  ;;  %s3953_s10 = smul.u32 56, %s5541_s27  ;;  %v4047_v39 = vld [vmem:[%s5524_s1 + $0x128] ss:$16 sps:$4 sm:$0xff]   ;;  %v4048_v40 = vld [vmem:[%s5524_s1 + $0x144] ss:$16 sps:$4 sm:$0xff]   ;;  %s3868_s29 = sshll.u32 %s5541_s27, 4 }
  0x55   : > { %1698 = vmatprep.subr.bf16.mxu0 %v4012_v16  ;;  %1862 = vmatprep.subr.bf16.mxu1 %v4014_v17  ;;  %v4050_v41 = vld [vmem:[%s5524_s1 + $0x14c] ss:$16 sps:$4 sm:$0xff]   ;;  %v4052_v42 = vld [vmem:[%s5524_s1 + $0x140] ss:$16 sps:$4 sm:$0xff]   ;;  %v4053_v43 = vld [vmem:[%s5524_s1 + $0x148] ss:$16 sps:$4 sm:$0xff]   ;;  %s308_s26 = scalar_lea.vmem %s5530_s7, %s3868_s29 }
  0x56   : > { %s4923_s19 = scalar_lea.vmem %s5523_s0, %s3953_s10  ;;  %v4054_v44 = vld [vmem:[%s5524_s1 + $0x164] ss:$16 sps:$4 sm:$0xff]   ;;  %v4056_v45 = vld [vmem:[%s5524_s1 + $0x16c] ss:$16 sps:$4 sm:$0xff]   ;;  %v4058_v47 = vld [vmem:[%s5524_s1 + $0x160] ss:$16 sps:$4 sm:$0xff]  }
  0x57   : > { %v311_v46 = vld [vmem:[%s4923_s19 + $0x8] sm:$0xff]  ;;  %v4060_v50 = vld [vmem:[%s5524_s1 + $0x184] ss:$16 sps:$4 sm:$0xff]   ;;  %v4064_v52 = vld [vmem:[%s5524_s1 + $0x180] ss:$16 sps:$4 sm:$0xff]  }
  0x58   : > { %1699 = vmatpush1.bf16.msra.mxu0 %v4016_v18  ;;  %1863 = vmatpush1.bf16.msra.mxu1 %v4017_v19  ;;  %v318_v48 = vpack.c.bf16 %v311_v46, %v311_v46  ;;  %v4059_v49 = vld [vmem:[%s5524_s1 + $0x168] ss:$16 sps:$4 sm:$0xff]   ;;  %v4062_v51 = vld [vmem:[%s5524_s1 + $0x18c] ss:$16 sps:$4 sm:$0xff]   ;;  %v4066_v54 = vld [vmem:[%s5524_s1 + $0x1a4] ss:$16 sps:$4 sm:$0xff]  }
  0x59   : > { %1700 = vmatprep.subr.bf16.mxu0 %v4018_v20  ;;  %1864 = vmatprep.subr.bf16.mxu1 %v4020_v21  ;;  %v4065_v53 = vld [vmem:[%s5524_s1 + $0x188] ss:$16 sps:$4 sm:$0xff]   ;;  %v4068_v55 = vld [vmem:[%s5524_s1 + $0x1ac] ss:$16 sps:$4 sm:$0xff]   ;;  %v4070_v56 = vld [vmem:[%s5524_s1 + $0x1a0] ss:$16 sps:$4 sm:$0xff]  }
  0x5a   : > { %1722 = vmatprep.mubr.bf16.mxu0 %v318_v48  ;;  %1886 = vmatprep.mubr.bf16.mxu1 %v318_v48  ;;  %v4071_v57 = vld [vmem:[%s5524_s1 + $0x1a8] ss:$16 sps:$4 sm:$0xff]   ;;  %v4072_v58 = vld [vmem:[%s5524_s1 + $0x1c4] ss:$16 sps:$4 sm:$0xff]   ;;  %v4074_v59 = vld [vmem:[%s5524_s1 + $0x1cc] ss:$16 sps:$4 sm:$0xff]  }
  0x5b   : > { %v4076_v60 = vld [vmem:[%s5524_s1 + $0x1c0] ss:$16 sps:$4 sm:$0xff]   ;;  %v4077_v61 = vld [vmem:[%s5524_s1 + $0x1c8] ss:$16 sps:$4 sm:$0xff]   ;;  %v4078_v62 = vld [vmem:[%s5524_s1 + $0x1e4] ss:$16 sps:$4 sm:$0xff]  }
  0x5c   : > { %1701 = vmatpush1.bf16.msra.mxu0 %v4022_v22  ;;  %1865 = vmatpush1.bf16.msra.mxu1 %v4023_v23  ;;  %v4080_v63 = vld [vmem:[%s5524_s1 + $0x1ec] ss:$16 sps:$4 sm:$0xff]   ;;  %v4082_v0 = vld [vmem:[%s5524_s1 + $0x1e0] ss:$16 sps:$4 sm:$0xff]   ;;  %v4083_v1 = vld [vmem:[%s5524_s1 + $0x1e8] ss:$16 sps:$4 sm:$0xff]  }
  0x5d   : > { %1702 = vmatprep.subr.bf16.mxu0 %v4024_v24  ;;  %1866 = vmatprep.subr.bf16.mxu1 %v4026_v25  ;;  %v310_v2 = vld [vmem:[%s4923_s19] sm:$0xff]  ;;  %v4089_v4 = vld [vmem:[%s5524_s1 + $0x20c] ss:$16 sps:$4 sm:$0xff]   ;;  %v4087_v7 = vld [vmem:[%s5524_s1 + $0x208] ss:$16 sps:$4 sm:$0xff]  }
  0x5e   : > { %v4086_v3 = vld [vmem:[%s5524_s1 + $0x204] ss:$16 sps:$4 sm:$0xff]   ;;  %v317_v5 = vpack.c.bf16 %v310_v2, %v310_v2  ;;  %v4084_v6 = vld [vmem:[%s5524_s1 + $0x200] ss:$16 sps:$4 sm:$0xff]   ;;  %v4095_v9 = vld [vmem:[%s5524_s1 + $0x22c] ss:$16 sps:$4 sm:$0xff]  }
  0x5f   : > { %v4092_v8 = vld [vmem:[%s5524_s1 + $0x224] ss:$16 sps:$4 sm:$0xff]   ;;  %v4090_v10 = vld [vmem:[%s5524_s1 + $0x220] ss:$16 sps:$4 sm:$0xff]   ;;  %v4093_v11 = vld [vmem:[%s5524_s1 + $0x228] ss:$16 sps:$4 sm:$0xff]  }
  0x60   : > { %1703 = vmatpush1.bf16.msra.mxu0 %v4028_v26  ;;  %1867 = vmatpush1.bf16.msra.mxu1 %v4029_v27  ;;  %v4098_v12 = vld [vmem:[%s5524_s1 + $0x244] ss:$16 sps:$4 sm:$0xff]   ;;  %v4101_v13 = vld [vmem:[%s5524_s1 + $0x24c] ss:$16 sps:$4 sm:$0xff]   ;;  %v4096_v14 = vld [vmem:[%s5524_s1 + $0x240] ss:$16 sps:$4 sm:$0xff]  }
  0x61   : > { %1704 = vmatprep.subr.bf16.mxu0 %v4030_v28  ;;  %1868 = vmatprep.subr.bf16.mxu1 %v4032_v29  ;;  %v4099_v15 = vld [vmem:[%s5524_s1 + $0x248] ss:$16 sps:$4 sm:$0xff]   ;;  %v4104_v16 = vld [vmem:[%s5524_s1 + $0x264] ss:$16 sps:$4 sm:$0xff]   ;;  %v4107_v17 = vld [vmem:[%s5524_s1 + $0x26c] ss:$16 sps:$4 sm:$0xff]  }
  0x62   : > { %v4102_v18 = vld [vmem:[%s5524_s1 + $0x260] ss:$16 sps:$4 sm:$0xff]   ;;  %v4105_v19 = vld [vmem:[%s5524_s1 + $0x268] ss:$16 sps:$4 sm:$0xff]   ;;  %v4110_v20 = vld [vmem:[%s5524_s1 + $0x284] ss:$16 sps:$4 sm:$0xff]  }
  0x63   : > { %v4113_v21 = vld [vmem:[%s5524_s1 + $0x28c] ss:$16 sps:$4 sm:$0xff]   ;;  %v4108_v22 = vld [vmem:[%s5524_s1 + $0x280] ss:$16 sps:$4 sm:$0xff]   ;;  %v4111_v23 = vld [vmem:[%s5524_s1 + $0x288] ss:$16 sps:$4 sm:$0xff]  }
  0x64   : > { %1705 = vmatpush1.bf16.msra.mxu0 %v4034_v30  ;;  %1869 = vmatpush1.bf16.msra.mxu1 %v4035_v31  ;;  %v4116_v24 = vld [vmem:[%s5524_s1 + $0x2a4] ss:$16 sps:$4 sm:$0xff]   ;;  %v4119_v25 = vld [vmem:[%s5524_s1 + $0x2ac] ss:$16 sps:$4 sm:$0xff]   ;;  %v4114_v26 = vld [vmem:[%s5524_s1 + $0x2a0] ss:$16 sps:$4 sm:$0xff]  }
  0x65   : > { %1706 = vmatprep.subr.bf16.mxu0 %v4036_v32  ;;  %1870 = vmatprep.subr.bf16.mxu1 %v4038_v33  ;;  %v4117_v27 = vld [vmem:[%s5524_s1 + $0x2a8] ss:$16 sps:$4 sm:$0xff]   ;;  %v4122_v28 = vld [vmem:[%s5524_s1 + $0x2c4] ss:$16 sps:$4 sm:$0xff]   ;;  %v4125_v29 = vld [vmem:[%s5524_s1 + $0x2cc] ss:$16 sps:$4 sm:$0xff]  }
  0x66   : > { %v313_v30 = vld [vmem:[%s4923_s19 + $0x18] sm:$0xff]  ;;  %v4120_v31 = vld [vmem:[%s5524_s1 + $0x2c0] ss:$16 sps:$4 sm:$0xff]   ;;  %v4146_v46 = vld [vmem:[%s5524_s1 + $0x344] ss:$16 sps:$4 sm:$0xff]  }
  0x67   : > { %v320_v32 = vpack.c.bf16 %v313_v30, %v313_v30  ;;  %v4123_v33 = vld [vmem:[%s5524_s1 + $0x2c8] ss:$16 sps:$4 sm:$0xff]   ;;  %v4144_v48 = vld [vmem:[%s5524_s1 + $0x340] ss:$16 sps:$4 sm:$0xff]   ;;  %v4176_v2 = vld [vmem:[%s5524_s1 + $0x3e4] ss:$16 sps:$4 sm:$0xff]  }
  0x68   : > { %1707 = vmatpush1.bf16.msra.mxu0 %v4040_v34  ;;  %1871 = vmatpush1.bf16.msra.mxu1 %v4041_v35  ;;  %v4128_v34 = vld [vmem:[%s5524_s1 + $0x2e4] ss:$16 sps:$4 sm:$0xff]   ;;  %v4131_v35 = vld [vmem:[%s5524_s1 + $0x2ec] ss:$16 sps:$4 sm:$0xff]  }
  0x69   : > { %1708 = vmatprep.subr.bf16.mxu0 %v4042_v36  ;;  %1872 = vmatprep.subr.bf16.mxu1 %v4044_v37  ;;  %v4126_v36 = vld [vmem:[%s5524_s1 + $0x2e0] ss:$16 sps:$4 sm:$0xff]   ;;  %v4129_v37 = vld [vmem:[%s5524_s1 + $0x2e8] ss:$16 sps:$4 sm:$0xff]   ;;  %v4212_v30 = vld [vmem:[%s5524_s1 + $0x4a4] ss:$16 sps:$4 sm:$0xff]  }
  0x6c   : > { %1709 = vmatpush1.bf16.msra.mxu0 %v4046_v38  ;;  %1873 = vmatpush1.bf16.msra.mxu1 %v4047_v39  ;;  %v4134_v38 = vld [vmem:[%s5524_s1 + $0x304] ss:$16 sps:$4 sm:$0xff]   ;;  %v4137_v39 = vld [vmem:[%s5524_s1 + $0x30c] ss:$16 sps:$4 sm:$0xff]  }
  0x6d   : > { %1710 = vmatprep.subr.bf16.mxu0 %v4048_v40  ;;  %1874 = vmatprep.subr.bf16.mxu1 %v4050_v41  ;;  %v4132_v40 = vld [vmem:[%s5524_s1 + $0x300] ss:$16 sps:$4 sm:$0xff]   ;;  %v4135_v41 = vld [vmem:[%s5524_s1 + $0x308] ss:$16 sps:$4 sm:$0xff]  }
  0x70   : > { %1711 = vmatpush1.bf16.msra.mxu0 %v4052_v42  ;;  %1875 = vmatpush1.bf16.msra.mxu1 %v4053_v43  ;;  %v4140_v42 = vld [vmem:[%s5524_s1 + $0x324] ss:$16 sps:$4 sm:$0xff]   ;;  %v4143_v43 = vld [vmem:[%s5524_s1 + $0x32c] ss:$16 sps:$4 sm:$0xff]  }
  0x71   : > { %1712 = vmatprep.subr.bf16.mxu0 %v4054_v44  ;;  %1876 = vmatprep.subr.bf16.mxu1 %v4056_v45  ;;  %v4138_v44 = vld [vmem:[%s5524_s1 + $0x320] ss:$16 sps:$4 sm:$0xff]   ;;  %v4141_v45 = vld [vmem:[%s5524_s1 + $0x328] ss:$16 sps:$4 sm:$0xff]  }
  0x74   : > { %1713 = vmatpush1.bf16.msra.mxu0 %v4058_v47  ;;  %1877 = vmatpush1.bf16.msra.mxu1 %v4059_v49  ;;  %v4149_v47 = vld [vmem:[%s5524_s1 + $0x34c] ss:$16 sps:$4 sm:$0xff]   ;;  %v4147_v49 = vld [vmem:[%s5524_s1 + $0x348] ss:$16 sps:$4 sm:$0xff]  }
  0x75   : > { %1714 = vmatprep.subr.bf16.mxu0 %v4060_v50  ;;  %1878 = vmatprep.subr.bf16.mxu1 %v4062_v51  ;;  %v4152_v50 = vld [vmem:[%s5524_s1 + $0x364] ss:$16 sps:$4 sm:$0xff]   ;;  %v4155_v51 = vld [vmem:[%s5524_s1 + $0x36c] ss:$16 sps:$4 sm:$0xff]  }
  0x78   : > { %1715 = vmatpush1.bf16.msra.mxu0 %v4064_v52  ;;  %1879 = vmatpush1.bf16.msra.mxu1 %v4065_v53  ;;  %v4150_v52 = vld [vmem:[%s5524_s1 + $0x360] ss:$16 sps:$4 sm:$0xff]   ;;  %v4153_v53 = vld [vmem:[%s5524_s1 + $0x368] ss:$16 sps:$4 sm:$0xff]  }
  0x79   : > { %1716 = vmatprep.subr.bf16.mxu0 %v4066_v54  ;;  %1880 = vmatprep.subr.bf16.mxu1 %v4068_v55  ;;  %v4158_v54 = vld [vmem:[%s5524_s1 + $0x384] ss:$16 sps:$4 sm:$0xff]   ;;  %v4161_v55 = vld [vmem:[%s5524_s1 + $0x38c] ss:$16 sps:$4 sm:$0xff]  }
  0x7c   : > { %1717 = vmatpush1.bf16.msra.mxu0 %v4070_v56  ;;  %1881 = vmatpush1.bf16.msra.mxu1 %v4071_v57  ;;  %v4156_v56 = vld [vmem:[%s5524_s1 + $0x380] ss:$16 sps:$4 sm:$0xff]   ;;  %v4159_v57 = vld [vmem:[%s5524_s1 + $0x388] ss:$16 sps:$4 sm:$0xff]  }
  0x7d   : > { %1718 = vmatprep.subr.bf16.mxu0 %v4072_v58  ;;  %1882 = vmatprep.subr.bf16.mxu1 %v4074_v59  ;;  %v4164_v58 = vld [vmem:[%s5524_s1 + $0x3a4] ss:$16 sps:$4 sm:$0xff]   ;;  %v4167_v59 = vld [vmem:[%s5524_s1 + $0x3ac] ss:$16 sps:$4 sm:$0xff]  }
  0x80   : > { %1719 = vmatpush1.bf16.msra.mxu0 %v4076_v60  ;;  %1883 = vmatpush1.bf16.msra.mxu1 %v4077_v61  ;;  %v4162_v60 = vld [vmem:[%s5524_s1 + $0x3a0] ss:$16 sps:$4 sm:$0xff]   ;;  %v4165_v61 = vld [vmem:[%s5524_s1 + $0x3a8] ss:$16 sps:$4 sm:$0xff]  }
  0x81   : > { %1720 = vmatprep.subr.bf16.mxu0 %v4078_v62  ;;  %1884 = vmatprep.subr.bf16.mxu1 %v4080_v63  ;;  %v4170_v62 = vld [vmem:[%s5524_s1 + $0x3c4] ss:$16 sps:$4 sm:$0xff]   ;;  %v4173_v63 = vld [vmem:[%s5524_s1 + $0x3cc] ss:$16 sps:$4 sm:$0xff]  }
  0x84   : > { %1721 = vmatpush1.bf16.msra.mxu0 %v4082_v0  ;;  %1885 = vmatpush1.bf16.msra.mxu1 %v4083_v1  ;;  %v4168_v0 = vld [vmem:[%s5524_s1 + $0x3c0] ss:$16 sps:$4 sm:$0xff]   ;;  %v4171_v1 = vld [vmem:[%s5524_s1 + $0x3c8] ss:$16 sps:$4 sm:$0xff]  }
  0x85   : > { %1731 = vmatprep.subr.bf16.mxu0 %v4086_v3  ;;  %1895 = vmatprep.subr.bf16.mxu1 %v4089_v4  ;;  %v4179_v3 = vld [vmem:[%s5524_s1 + $0x3ec] ss:$16 sps:$4 sm:$0xff]   ;;  %v4174_v4 = vld [vmem:[%s5524_s1 + $0x3e0] ss:$16 sps:$4 sm:$0xff]  }
  0x87   : > { %1723 = vmatmul.mubr.bf16.vlgmr.msra.gmra.mrb[0].mxu0 %v317_v5  ;;  %1887 = vmatmul.mubr.bf16.vlgmr.msra.gmra.mrb[0].mxu1 %v317_v5  ;;  %v4177_v5 = vld [vmem:[%s5524_s1 + $0x3e8] ss:$16 sps:$4 sm:$0xff]  }
  0x88   : > { %1732 = vmatpush1.bf16.msra.mxu0 %v4084_v6  ;;  %1896 = vmatpush1.bf16.msra.mxu1 %v4087_v7  ;;  %v4182_v6 = vld [vmem:[%s5524_s1 + $0x404] ss:$16 sps:$4 sm:$0xff]  }
  0x89   : > { %1733 = vmatprep.subr.bf16.mxu0 %v4092_v8  ;;  %1897 = vmatprep.subr.bf16.mxu1 %v4095_v9  ;;  %v312_v7 = vld [vmem:[%s4923_s19 + $0x10] sm:$0xff]  ;;  %v4185_v8 = vld [vmem:[%s5524_s1 + $0x40c] ss:$16 sps:$4 sm:$0xff]  }
  0x8a   : > { %1763 = vmatprep.mubr.bf16.mxu0 %v320_v32  ;;  %1927 = vmatprep.mubr.bf16.mxu1 %v320_v32  ;;  %v4180_v9 = vld [vmem:[%s5524_s1 + $0x400] ss:$16 sps:$4 sm:$0xff]  }
  0x8b   : > { %v4210_v32 = vld [vmem:[%s5524_s1 + $0x4a0] ss:$16 sps:$4 sm:$0xff]  }
  0x8c   : > { %1734 = vmatpush1.bf16.msra.mxu0 %v4090_v10  ;;  %1898 = vmatpush1.bf16.msra.mxu1 %v4093_v11  ;;  %v4183_v10 = vld [vmem:[%s5524_s1 + $0x408] ss:$16 sps:$4 sm:$0xff]   ;;  %v319_v11 = vpack.c.bf16 %v312_v7, %v312_v7  ;;  %v4275_v7 = vld [vmem:[%s5524_s1 + $0x5ec] ss:$16 sps:$4 sm:$0xff]  }
  0x8d   : > { %1735 = vmatprep.subr.bf16.mxu0 %v4098_v12  ;;  %1899 = vmatprep.subr.bf16.mxu1 %v4101_v13  ;;  %v4188_v12 = vld [vmem:[%s5524_s1 + $0x424] ss:$16 sps:$4 sm:$0xff]   ;;  %v4191_v13 = vld [vmem:[%s5524_s1 + $0x42c] ss:$16 sps:$4 sm:$0xff]  }
  0x90   : > { %1736 = vmatpush1.bf16.msra.mxu0 %v4096_v14  ;;  %1900 = vmatpush1.bf16.msra.mxu1 %v4099_v15  ;;  %v315_v14 = vld [vmem:[%s4923_s19 + $0x28] sm:$0xff] }
  0x91   : > { %1737 = vmatprep.subr.bf16.mxu0 %v4104_v16  ;;  %1901 = vmatprep.subr.bf16.mxu1 %v4107_v17  ;;  %v322_v15 = vpack.c.bf16 %v315_v14, %v315_v14  ;;  %v4186_v16 = vld [vmem:[%s5524_s1 + $0x420] ss:$16 sps:$4 sm:$0xff]   ;;  %v4189_v17 = vld [vmem:[%s5524_s1 + $0x428] ss:$16 sps:$4 sm:$0xff]  }
  0x92   : > { %v4279_v14 = vld [vmem:[%s5524_s1 + $0x608] ss:$16 sps:$4 sm:$0xff]  }
  0x94   : > { %1738 = vmatpush1.bf16.msra.mxu0 %v4102_v18  ;;  %1902 = vmatpush1.bf16.msra.mxu1 %v4105_v19  ;;  %v4194_v18 = vld [vmem:[%s5524_s1 + $0x444] ss:$16 sps:$4 sm:$0xff]   ;;  %v4197_v19 = vld [vmem:[%s5524_s1 + $0x44c] ss:$16 sps:$4 sm:$0xff]  }
  0x95   : > { %1739 = vmatprep.subr.bf16.mxu0 %v4110_v20  ;;  %1903 = vmatprep.subr.bf16.mxu1 %v4113_v21  ;;  %v4192_v20 = vld [vmem:[%s5524_s1 + $0x440] ss:$16 sps:$4 sm:$0xff]   ;;  %v4195_v21 = vld [vmem:[%s5524_s1 + $0x448] ss:$16 sps:$4 sm:$0xff]  }
  0x98   : > { %1740 = vmatpush1.bf16.msra.mxu0 %v4108_v22  ;;  %1904 = vmatpush1.bf16.msra.mxu1 %v4111_v23  ;;  %v4200_v22 = vld [vmem:[%s5524_s1 + $0x464] ss:$16 sps:$4 sm:$0xff]   ;;  %v4203_v23 = vld [vmem:[%s5524_s1 + $0x46c] ss:$16 sps:$4 sm:$0xff]  }
  0x99   : > { %1741 = vmatprep.subr.bf16.mxu0 %v4116_v24  ;;  %1905 = vmatprep.subr.bf16.mxu1 %v4119_v25  ;;  %v4198_v24 = vld [vmem:[%s5524_s1 + $0x460] ss:$16 sps:$4 sm:$0xff]   ;;  %v4201_v25 = vld [vmem:[%s5524_s1 + $0x468] ss:$16 sps:$4 sm:$0xff]  }
  0x9c   : > { %1742 = vmatpush1.bf16.msra.mxu0 %v4114_v26  ;;  %1906 = vmatpush1.bf16.msra.mxu1 %v4117_v27  ;;  %v4206_v26 = vld [vmem:[%s5524_s1 + $0x484] ss:$16 sps:$4 sm:$0xff]   ;;  %v4209_v27 = vld [vmem:[%s5524_s1 + $0x48c] ss:$16 sps:$4 sm:$0xff]  }
  0x9d   : > { %1743 = vmatprep.subr.bf16.mxu0 %v4122_v28  ;;  %1907 = vmatprep.subr.bf16.mxu1 %v4125_v29  ;;  %v4204_v28 = vld [vmem:[%s5524_s1 + $0x480] ss:$16 sps:$4 sm:$0xff]   ;;  %v4207_v29 = vld [vmem:[%s5524_s1 + $0x488] ss:$16 sps:$4 sm:$0xff]  }
  0xa0   : > { %1744 = vmatpush1.bf16.msra.mxu0 %v4120_v31  ;;  %1908 = vmatpush1.bf16.msra.mxu1 %v4123_v33  ;;  %v4215_v31 = vld [vmem:[%s5524_s1 + $0x4ac] ss:$16 sps:$4 sm:$0xff]   ;;  %v4213_v33 = vld [vmem:[%s5524_s1 + $0x4a8] ss:$16 sps:$4 sm:$0xff]  }
  0xa1   : > { %1745 = vmatprep.subr.bf16.mxu0 %v4128_v34  ;;  %1909 = vmatprep.subr.bf16.mxu1 %v4131_v35  ;;  %v4218_v34 = vld [vmem:[%s5524_s1 + $0x4c4] ss:$16 sps:$4 sm:$0xff]   ;;  %v4221_v35 = vld [vmem:[%s5524_s1 + $0x4cc] ss:$16 sps:$4 sm:$0xff]  }
  0xa4   : > { %1746 = vmatpush1.bf16.msra.mxu0 %v4126_v36  ;;  %1910 = vmatpush1.bf16.msra.mxu1 %v4129_v37  ;;  %v4216_v36 = vld [vmem:[%s5524_s1 + $0x4c0] ss:$16 sps:$4 sm:$0xff]   ;;  %v4219_v37 = vld [vmem:[%s5524_s1 + $0x4c8] ss:$16 sps:$4 sm:$0xff]  }
  0xa5   : > { %1747 = vmatprep.subr.bf16.mxu0 %v4134_v38  ;;  %1911 = vmatprep.subr.bf16.mxu1 %v4137_v39  ;;  %v4224_v38 = vld [vmem:[%s5524_s1 + $0x4e4] ss:$16 sps:$4 sm:$0xff]   ;;  %v4227_v39 = vld [vmem:[%s5524_s1 + $0x4ec] ss:$16 sps:$4 sm:$0xff]  }
  0xa8   : > { %1748 = vmatpush1.bf16.msra.mxu0 %v4132_v40  ;;  %1912 = vmatpush1.bf16.msra.mxu1 %v4135_v41  ;;  %v4222_v40 = vld [vmem:[%s5524_s1 + $0x4e0] ss:$16 sps:$4 sm:$0xff]   ;;  %v4225_v41 = vld [vmem:[%s5524_s1 + $0x4e8] ss:$16 sps:$4 sm:$0xff]  }
  0xa9   : > { %1749 = vmatprep.subr.bf16.mxu0 %v4140_v42  ;;  %1913 = vmatprep.subr.bf16.mxu1 %v4143_v43  ;;  %v4230_v42 = vld [vmem:[%s5524_s1 + $0x504] ss:$16 sps:$4 sm:$0xff]   ;;  %v4233_v43 = vld [vmem:[%s5524_s1 + $0x50c] ss:$16 sps:$4 sm:$0xff]  }
  0xac   : > { %1750 = vmatpush1.bf16.msra.mxu0 %v4138_v44  ;;  %1914 = vmatpush1.bf16.msra.mxu1 %v4141_v45  ;;  %v4228_v44 = vld [vmem:[%s5524_s1 + $0x500] ss:$16 sps:$4 sm:$0xff]   ;;  %v4231_v45 = vld [vmem:[%s5524_s1 + $0x508] ss:$16 sps:$4 sm:$0xff]  }
  0xad   : > { %1751 = vmatprep.subr.bf16.mxu0 %v4146_v46  ;;  %1915 = vmatprep.subr.bf16.mxu1 %v4149_v47  ;;  %v4236_v46 = vld [vmem:[%s5524_s1 + $0x524] ss:$16 sps:$4 sm:$0xff]   ;;  %v4239_v47 = vld [vmem:[%s5524_s1 + $0x52c] ss:$16 sps:$4 sm:$0xff]  }
  0xb0   : > { %1752 = vmatpush1.bf16.msra.mxu0 %v4144_v48  ;;  %1916 = vmatpush1.bf16.msra.mxu1 %v4147_v49  ;;  %v4234_v48 = vld [vmem:[%s5524_s1 + $0x520] ss:$16 sps:$4 sm:$0xff]   ;;  %v4237_v49 = vld [vmem:[%s5524_s1 + $0x528] ss:$16 sps:$4 sm:$0xff]  }
  0xb1   : > { %1753 = vmatprep.subr.bf16.mxu0 %v4152_v50  ;;  %1917 = vmatprep.subr.bf16.mxu1 %v4155_v51  ;;  %v4242_v50 = vld [vmem:[%s5524_s1 + $0x544] ss:$16 sps:$4 sm:$0xff]   ;;  %v4245_v51 = vld [vmem:[%s5524_s1 + $0x54c] ss:$16 sps:$4 sm:$0xff]  }
  0xb4   : > { %1754 = vmatpush1.bf16.msra.mxu0 %v4150_v52  ;;  %1918 = vmatpush1.bf16.msra.mxu1 %v4153_v53  ;;  %v4240_v52 = vld [vmem:[%s5524_s1 + $0x540] ss:$16 sps:$4 sm:$0xff]   ;;  %v4243_v53 = vld [vmem:[%s5524_s1 + $0x548] ss:$16 sps:$4 sm:$0xff]  }
  0xb5   : > { %1755 = vmatprep.subr.bf16.mxu0 %v4158_v54  ;;  %1919 = vmatprep.subr.bf16.mxu1 %v4161_v55  ;;  %v4248_v54 = vld [vmem:[%s5524_s1 + $0x564] ss:$16 sps:$4 sm:$0xff]   ;;  %v4251_v55 = vld [vmem:[%s5524_s1 + $0x56c] ss:$16 sps:$4 sm:$0xff]  }
  0xb8   : > { %1756 = vmatpush1.bf16.msra.mxu0 %v4156_v56  ;;  %1920 = vmatpush1.bf16.msra.mxu1 %v4159_v57  ;;  %v4246_v56 = vld [vmem:[%s5524_s1 + $0x560] ss:$16 sps:$4 sm:$0xff]   ;;  %v4249_v57 = vld [vmem:[%s5524_s1 + $0x568] ss:$16 sps:$4 sm:$0xff]  }
  0xb9   : > { %1757 = vmatprep.subr.bf16.mxu0 %v4164_v58  ;;  %1921 = vmatprep.subr.bf16.mxu1 %v4167_v59  ;;  %v4254_v58 = vld [vmem:[%s5524_s1 + $0x584] ss:$16 sps:$4 sm:$0xff]   ;;  %v4257_v59 = vld [vmem:[%s5524_s1 + $0x58c] ss:$16 sps:$4 sm:$0xff]  }
  0xbc   : > { %1758 = vmatpush1.bf16.msra.mxu0 %v4162_v60  ;;  %1922 = vmatpush1.bf16.msra.mxu1 %v4165_v61  ;;  %v4252_v60 = vld [vmem:[%s5524_s1 + $0x580] ss:$16 sps:$4 sm:$0xff]   ;;  %v4255_v61 = vld [vmem:[%s5524_s1 + $0x588] ss:$16 sps:$4 sm:$0xff]  }
  0xbd   : > { %1759 = vmatprep.subr.bf16.mxu0 %v4170_v62  ;;  %1923 = vmatprep.subr.bf16.mxu1 %v4173_v63  ;;  %v4260_v62 = vld [vmem:[%s5524_s1 + $0x5a4] ss:$16 sps:$4 sm:$0xff]   ;;  %v4263_v63 = vld [vmem:[%s5524_s1 + $0x5ac] ss:$16 sps:$4 sm:$0xff]  }
  0xc0   : > { %1760 = vmatpush1.bf16.msra.mxu0 %v4168_v0  ;;  %1924 = vmatpush1.bf16.msra.mxu1 %v4171_v1  ;;  %v4258_v0 = vld [vmem:[%s5524_s1 + $0x5a0] ss:$16 sps:$4 sm:$0xff]   ;;  %v4261_v1 = vld [vmem:[%s5524_s1 + $0x5a8] ss:$16 sps:$4 sm:$0xff]  }
  0xc1   : > { %1761 = vmatprep.subr.bf16.mxu0 %v4176_v2  ;;  %1925 = vmatprep.subr.bf16.mxu1 %v4179_v3  ;;  %v4266_v2 = vld [vmem:[%s5524_s1 + $0x5c4] ss:$16 sps:$4 sm:$0xff]   ;;  %v4269_v3 = vld [vmem:[%s5524_s1 + $0x5cc] ss:$16 sps:$4 sm:$0xff]  }
  0xc4   : > { %1762 = vmatpush1.bf16.msra.mxu0 %v4174_v4  ;;  %1926 = vmatpush1.bf16.msra.mxu1 %v4177_v5  ;;  %v4264_v4 = vld [vmem:[%s5524_s1 + $0x5c0] ss:$16 sps:$4 sm:$0xff]   ;;  %v4267_v5 = vld [vmem:[%s5524_s1 + $0x5c8] ss:$16 sps:$4 sm:$0xff]  }
  0xc5   : > { %1772 = vmatprep.subr.bf16.mxu0 %v4182_v6  ;;  %1936 = vmatprep.subr.bf16.mxu1 %v4185_v8  ;;  %v4272_v6 = vld [vmem:[%s5524_s1 + $0x5e4] ss:$16 sps:$4 sm:$0xff]   ;;  %v4270_v8 = vld [vmem:[%s5524_s1 + $0x5e0] ss:$16 sps:$4 sm:$0xff]  }
  0xc7   : > { %1764 = vmatmul.mubr.bf16.vlgmr.msra.gmra.mrb[0].mxu0 %v319_v11  ;;  %1928 = vmatmul.mubr.bf16.vlgmr.msra.gmra.mrb[0].mxu1 %v319_v11  ;;  %v4278_v11 = vld [vmem:[%s5524_s1 + $0x604] ss:$16 sps:$4 sm:$0xff]  }
  0xc8   : > { %1773 = vmatpush1.bf16.msra.mxu0 %v4180_v9  ;;  %1937 = vmatpush1.bf16.msra.mxu1 %v4183_v10  ;;  %v4273_v9 = vld [vmem:[%s5524_s1 + $0x5e8] ss:$16 sps:$4 sm:$0xff]   ;;  %v314_v10 = vld [vmem:[%s4923_s19 + $0x20] sm:$0xff] }
  0xc9   : > { %1774 = vmatprep.subr.bf16.mxu0 %v4188_v12  ;;  %1938 = vmatprep.subr.bf16.mxu1 %v4191_v13  ;;  %v4281_v12 = vld [vmem:[%s5524_s1 + $0x60c] ss:$16 sps:$4 sm:$0xff]   ;;  %v4276_v13 = vld [vmem:[%s5524_s1 + $0x600] ss:$16 sps:$4 sm:$0xff]  }
  0xca   : > { %1804 = vmatprep.mubr.bf16.mxu0 %v322_v15  ;;  %1968 = vmatprep.mubr.bf16.mxu1 %v322_v15  ;;  %v321_v15 = vpack.c.bf16 %v314_v10, %v314_v10  ;;  %v4363_v10 = vld [vmem:[#allocation2 + $0xc8] ss:$16 sps:$4 sm:$0xff]  }
  0xcc   : > { %1775 = vmatpush1.bf16.msra.mxu0 %v4186_v16  ;;  %1939 = vmatpush1.bf16.msra.mxu1 %v4189_v17  ;;  %v4284_v16 = vld [vmem:[%s5524_s1 + $0x624] ss:$16 sps:$4 sm:$0xff]   ;;  %v4287_v17 = vld [vmem:[%s5524_s1 + $0x62c] ss:$16 sps:$4 sm:$0xff]  }
  0xcd   : > { %1776 = vmatprep.subr.bf16.mxu0 %v4194_v18  ;;  %1940 = vmatprep.subr.bf16.mxu1 %v4197_v19  ;;  %v4282_v18 = vld [vmem:[%s5524_s1 + $0x620] ss:$16 sps:$4 sm:$0xff]   ;;  %v4285_v19 = vld [vmem:[%s5524_s1 + $0x628] ss:$16 sps:$4 sm:$0xff]  }
  0xd0   : > { %1777 = vmatpush1.bf16.msra.mxu0 %v4192_v20  ;;  %1941 = vmatpush1.bf16.msra.mxu1 %v4195_v21  ;;  %v4290_v20 = vld [vmem:[%s5524_s1 + $0x644] ss:$16 sps:$4 sm:$0xff]   ;;  %v4293_v21 = vld [vmem:[%s5524_s1 + $0x64c] ss:$16 sps:$4 sm:$0xff]  }
  0xd1   : > { %1778 = vmatprep.subr.bf16.mxu0 %v4200_v22  ;;  %1942 = vmatprep.subr.bf16.mxu1 %v4203_v23  ;;  %v4288_v22 = vld [vmem:[%s5524_s1 + $0x640] ss:$16 sps:$4 sm:$0xff]   ;;  %v4291_v23 = vld [vmem:[%s5524_s1 + $0x648] ss:$16 sps:$4 sm:$0xff]  }
  0xd4   : > { %1779 = vmatpush1.bf16.msra.mxu0 %v4198_v24  ;;  %1943 = vmatpush1.bf16.msra.mxu1 %v4201_v25  ;;  %v4660_v24 = vmov 0   ;;  %v4296_v25 = vld [vmem:[%s5524_s1 + $0x664] ss:$16 sps:$4 sm:$0xff]  }
  0xd5   : > { %1780 = vmatprep.subr.bf16.mxu0 %v4206_v26  ;;  %1944 = vmatprep.subr.bf16.mxu1 %v4209_v27  ;;  %v4299_v26 = vld [vmem:[%s5524_s1 + $0x66c] ss:$16 sps:$4 sm:$0xff]   ;;  %v4294_v27 = vld [vmem:[%s5524_s1 + $0x660] ss:$16 sps:$4 sm:$0xff]  }
  0xd8   : > { %1781 = vmatpush1.bf16.msra.mxu0 %v4204_v28  ;;  %1945 = vmatpush1.bf16.msra.mxu1 %v4207_v29  ;;  %v4297_v28 = vld [vmem:[%s5524_s1 + $0x668] ss:$16 sps:$4 sm:$0xff]   ;;  %v4302_v29 = vld [vmem:[%s5524_s1 + $0x684] ss:$16 sps:$4 sm:$0xff]  }
  0xd9   : > { %1782 = vmatprep.subr.bf16.mxu0 %v4212_v30  ;;  %1946 = vmatprep.subr.bf16.mxu1 %v4215_v31  ;;  %v4305_v30 = vld [vmem:[%s5524_s1 + $0x68c] ss:$16 sps:$4 sm:$0xff]   ;;  %v4300_v31 = vld [vmem:[%s5524_s1 + $0x680] ss:$16 sps:$4 sm:$0xff]  }
  0xdc   : > { %1783 = vmatpush1.bf16.msra.mxu0 %v4210_v32  ;;  %1947 = vmatpush1.bf16.msra.mxu1 %v4213_v33  ;;  %v4303_v32 = vld [vmem:[%s5524_s1 + $0x688] ss:$16 sps:$4 sm:$0xff]   ;;  %v4308_v33 = vld [vmem:[%s5524_s1 + $0x6a4] ss:$16 sps:$4 sm:$0xff]  }
  0xdd   : > { %1784 = vmatprep.subr.bf16.mxu0 %v4218_v34  ;;  %1948 = vmatprep.subr.bf16.mxu1 %v4221_v35  ;;  %v4311_v34 = vld [vmem:[%s5524_s1 + $0x6ac] ss:$16 sps:$4 sm:$0xff]   ;;  %v4306_v35 = vld [vmem:[%s5524_s1 + $0x6a0] ss:$16 sps:$4 sm:$0xff]  }
  0xe0   : > { %1785 = vmatpush1.bf16.msra.mxu0 %v4216_v36  ;;  %1949 = vmatpush1.bf16.msra.mxu1 %v4219_v37  ;;  %v4309_v36 = vld [vmem:[%s5524_s1 + $0x6a8] ss:$16 sps:$4 sm:$0xff]   ;;  %v4314_v37 = vld [vmem:[%s5524_s1 + $0x6c4] ss:$16 sps:$4 sm:$0xff]  }
  0xe1   : > { %1786 = vmatprep.subr.bf16.mxu0 %v4224_v38  ;;  %1950 = vmatprep.subr.bf16.mxu1 %v4227_v39  ;;  %v4317_v38 = vld [vmem:[%s5524_s1 + $0x6cc] ss:$16 sps:$4 sm:$0xff]   ;;  %v4312_v39 = vld [vmem:[%s5524_s1 + $0x6c0] ss:$16 sps:$4 sm:$0xff]  }
  0xe4   : > { %1787 = vmatpush1.bf16.msra.mxu0 %v4222_v40  ;;  %1951 = vmatpush1.bf16.msra.mxu1 %v4225_v41  ;;  %v4315_v40 = vld [vmem:[%s5524_s1 + $0x6c8] ss:$16 sps:$4 sm:$0xff]   ;;  %v4320_v41 = vld [vmem:[%s5524_s1 + $0x6e4] ss:$16 sps:$4 sm:$0xff]  }
  0xe5   : > { %1788 = vmatprep.subr.bf16.mxu0 %v4230_v42  ;;  %1952 = vmatprep.subr.bf16.mxu1 %v4233_v43  ;;  %v4323_v42 = vld [vmem:[%s5524_s1 + $0x6ec] ss:$16 sps:$4 sm:$0xff]   ;;  %v4318_v43 = vld [vmem:[%s5524_s1 + $0x6e0] ss:$16 sps:$4 sm:$0xff]  }
  0xe8   : > { %1789 = vmatpush1.bf16.msra.mxu0 %v4228_v44  ;;  %1953 = vmatpush1.bf16.msra.mxu1 %v4231_v45  ;;  %v4321_v44 = vld [vmem:[%s5524_s1 + $0x6e8] ss:$16 sps:$4 sm:$0xff]   ;;  %v316_v45 = vld [vmem:[%s4923_s19 + $0x30] sm:$0xff] }
  0xe9   : > { %1790 = vmatprep.subr.bf16.mxu0 %v4236_v46  ;;  %1954 = vmatprep.subr.bf16.mxu1 %v4239_v47  ;;  %v4326_v46 = vld [vmem:[#allocation2 + $0x4] ss:$16 sps:$4 sm:$0xff]   ;;  %v4329_v47 = vld [vmem:[#allocation2 + $0xc] ss:$16 sps:$4 sm:$0xff]  }
  0xec   : > { %1791 = vmatpush1.bf16.msra.mxu0 %v4234_v48  ;;  %1955 = vmatpush1.bf16.msra.mxu1 %v4237_v49  ;;  %v4324_v48 = vld [vmem:[#allocation2] ss:$16 sps:$4 sm:$0xff]   ;;  %v4327_v49 = vld [vmem:[#allocation2 + $0x8] ss:$16 sps:$4 sm:$0xff]  }
  0xed   : > { %1792 = vmatprep.subr.bf16.mxu0 %v4242_v50  ;;  %1956 = vmatprep.subr.bf16.mxu1 %v4245_v51  ;;  %v323_v50 = vpack.c.bf16 %v316_v45, %v316_v45  ;;  %v4332_v51 = vld [vmem:[#allocation2 + $0x24] ss:$16 sps:$4 sm:$0xff]   ;;  %v4414_v45 = vld [vmem:[#allocation2 + $0x1e0] ss:$16 sps:$4 sm:$0xff]  }
  0xf0   : > { %1793 = vmatpush1.bf16.msra.mxu0 %v4240_v52  ;;  %1957 = vmatpush1.bf16.msra.mxu1 %v4243_v53  ;;  %v4335_v52 = vld [vmem:[#allocation2 + $0x2c] ss:$16 sps:$4 sm:$0xff]   ;;  %v4330_v53 = vld [vmem:[#allocation2 + $0x20] ss:$16 sps:$4 sm:$0xff]  }
  0xf1   : > { %1794 = vmatprep.subr.bf16.mxu0 %v4248_v54  ;;  %1958 = vmatprep.subr.bf16.mxu1 %v4251_v55  ;;  %v4333_v54 = vld [vmem:[#allocation2 + $0x28] ss:$16 sps:$4 sm:$0xff]   ;;  %v4338_v55 = vld [vmem:[#allocation2 + $0x44] ss:$16 sps:$4 sm:$0xff]  }
  0xf4   : > { %1795 = vmatpush1.bf16.msra.mxu0 %v4246_v56  ;;  %1959 = vmatpush1.bf16.msra.mxu1 %v4249_v57  ;;  %v4341_v56 = vld [vmem:[#allocation2 + $0x4c] ss:$16 sps:$4 sm:$0xff]   ;;  %v4336_v57 = vld [vmem:[#allocation2 + $0x40] ss:$16 sps:$4 sm:$0xff]  }
  0xf5   : > { %1796 = vmatprep.subr.bf16.mxu0 %v4254_v58  ;;  %1960 = vmatprep.subr.bf16.mxu1 %v4257_v59  ;;  %v4339_v58 = vld [vmem:[#allocation2 + $0x48] ss:$16 sps:$4 sm:$0xff]   ;;  %v4344_v59 = vld [vmem:[#allocation2 + $0x64] ss:$16 sps:$4 sm:$0xff]  }
  0xf8   : > { %1797 = vmatpush1.bf16.msra.mxu0 %v4252_v60  ;;  %1961 = vmatpush1.bf16.msra.mxu1 %v4255_v61  ;;  %v4347_v60 = vld [vmem:[#allocation2 + $0x6c] ss:$16 sps:$4 sm:$0xff]   ;;  %v4342_v61 = vld [vmem:[#allocation2 + $0x60] ss:$16 sps:$4 sm:$0xff]  }
  0xf9   : > { %1798 = vmatprep.subr.bf16.mxu0 %v4260_v62  ;;  %1962 = vmatprep.subr.bf16.mxu1 %v4263_v63  ;;  %v4345_v62 = vld [vmem:[#allocation2 + $0x68] ss:$16 sps:$4 sm:$0xff]   ;;  %v4350_v63 = vld [vmem:[#allocation2 + $0x84] ss:$16 sps:$4 sm:$0xff]  }
  0xfc   : > { %1799 = vmatpush1.bf16.msra.mxu0 %v4258_v0  ;;  %1963 = vmatpush1.bf16.msra.mxu1 %v4261_v1  ;;  %v4353_v0 = vld [vmem:[#allocation2 + $0x8c] ss:$16 sps:$4 sm:$0xff]   ;;  %v4348_v1 = vld [vmem:[#allocation2 + $0x80] ss:$16 sps:$4 sm:$0xff]  }
  0xfd   : > { %1800 = vmatprep.subr.bf16.mxu0 %v4266_v2  ;;  %1964 = vmatprep.subr.bf16.mxu1 %v4269_v3  ;;  %v4351_v2 = vld [vmem:[#allocation2 + $0x88] ss:$16 sps:$4 sm:$0xff]   ;;  %v4356_v3 = vld [vmem:[#allocation2 + $0xa4] ss:$16 sps:$4 sm:$0xff]  }
 0x100   : > { %1801 = vmatpush1.bf16.msra.mxu0 %v4264_v4  ;;  %1965 = vmatpush1.bf16.msra.mxu1 %v4267_v5  ;;  %v4359_v4 = vld [vmem:[#allocation2 + $0xac] ss:$16 sps:$4 sm:$0xff]   ;;  %v4354_v5 = vld [vmem:[#allocation2 + $0xa0] ss:$16 sps:$4 sm:$0xff]  }
 0x101   : > { %1802 = vmatprep.subr.bf16.mxu0 %v4272_v6  ;;  %1966 = vmatprep.subr.bf16.mxu1 %v4275_v7  ;;  %v4357_v6 = vld [vmem:[#allocation2 + $0xa8] ss:$16 sps:$4 sm:$0xff]   ;;  %v4362_v7 = vld [vmem:[#allocation2 + $0xc4] ss:$16 sps:$4 sm:$0xff]  }
 0x104   : > { %1803 = vmatpush1.bf16.msra.mxu0 %v4270_v8  ;;  %1967 = vmatpush1.bf16.msra.mxu1 %v4273_v9  ;;  %v4365_v8 = vld [vmem:[#allocation2 + $0xcc] ss:$16 sps:$4 sm:$0xff]   ;;  %v4360_v9 = vld [vmem:[#allocation2 + $0xc0] ss:$16 sps:$4 sm:$0xff]  }
 0x105   : > { %1813 = vmatprep.subr.bf16.mxu0 %v4278_v11  ;;  %1977 = vmatprep.subr.bf16.mxu1 %v4281_v12  ;;  %v4368_v11 = vld [vmem:[#allocation2 + $0xe4] ss:$16 sps:$4 sm:$0xff]   ;;  %v4371_v12 = vld [vmem:[#allocation2 + $0xec] ss:$16 sps:$4 sm:$0xff]  }
 0x107   : > { %1805 = vmatmul.mubr.bf16.vlgmr.msra.gmra.mrb[0].mxu0 %v321_v15  ;;  %1969 = vmatmul.mubr.bf16.vlgmr.msra.gmra.mrb[0].mxu1 %v321_v15  ;;  %v4374_v15 = vld [vmem:[#allocation2 + $0x104] ss:$16 sps:$4 sm:$0xff]  }
 0x108   : > { %1814 = vmatpush1.bf16.msra.mxu0 %v4276_v13  ;;  %1978 = vmatpush1.bf16.msra.mxu1 %v4279_v14  ;;  %v4366_v13 = vld [vmem:[#allocation2 + $0xe0] ss:$16 sps:$4 sm:$0xff]   ;;  %v4369_v14 = vld [vmem:[#allocation2 + $0xe8] ss:$16 sps:$4 sm:$0xff]  }
 0x109   : > { %1815 = vmatprep.subr.bf16.mxu0 %v4284_v16  ;;  %1979 = vmatprep.subr.bf16.mxu1 %v4287_v17  ;;  %v4377_v16 = vld [vmem:[#allocation2 + $0x10c] ss:$16 sps:$4 sm:$0xff]   ;;  %v4372_v17 = vld [vmem:[#allocation2 + $0x100] ss:$16 sps:$4 sm:$0xff]  }
 0x10a   : > { %1845 = vmatprep.mubr.bf16.mxu0 %v4660_v24  ;;  %2009 = vmatprep.mubr.bf16.mxu1 %v4660_v24  ;;  %v4389_v24 = vld [vmem:[#allocation2 + $0x14c] ss:$16 sps:$4 sm:$0xff]  }
 0x10c   : > { %1816 = vmatpush1.bf16.msra.mxu0 %v4282_v18  ;;  %1980 = vmatpush1.bf16.msra.mxu1 %v4285_v19  ;;  %v4375_v18 = vld [vmem:[#allocation2 + $0x108] ss:$16 sps:$4 sm:$0xff]   ;;  %v4380_v19 = vld [vmem:[#allocation2 + $0x124] ss:$16 sps:$4 sm:$0xff]  }
 0x10d   : > { %1817 = vmatprep.subr.bf16.mxu0 %v4290_v20  ;;  %1981 = vmatprep.subr.bf16.mxu1 %v4293_v21  ;;  %v4383_v20 = vld [vmem:[#allocation2 + $0x12c] ss:$16 sps:$4 sm:$0xff]   ;;  %v4378_v21 = vld [vmem:[#allocation2 + $0x120] ss:$16 sps:$4 sm:$0xff]  }
 0x110   : > { %1818 = vmatpush1.bf16.msra.mxu0 %v4288_v22  ;;  %1982 = vmatpush1.bf16.msra.mxu1 %v4291_v23  ;;  %v4381_v22 = vld [vmem:[#allocation2 + $0x128] ss:$16 sps:$4 sm:$0xff]   ;;  %v4386_v23 = vld [vmem:[#allocation2 + $0x144] ss:$16 sps:$4 sm:$0xff]  }
 0x111   : > { %1819 = vmatprep.subr.bf16.mxu0 %v4296_v25  ;;  %1983 = vmatprep.subr.bf16.mxu1 %v4299_v26  ;;  %v4384_v25 = vld [vmem:[#allocation2 + $0x140] ss:$16 sps:$4 sm:$0xff]   ;;  %v4387_v26 = vld [vmem:[#allocation2 + $0x148] ss:$16 sps:$4 sm:$0xff]  }
 0x114   : > { %1820 = vmatpush1.bf16.msra.mxu0 %v4294_v27  ;;  %1984 = vmatpush1.bf16.msra.mxu1 %v4297_v28  ;;  %v4392_v27 = vld [vmem:[#allocation2 + $0x164] ss:$16 sps:$4 sm:$0xff]   ;;  %v4395_v28 = vld [vmem:[#allocation2 + $0x16c] ss:$16 sps:$4 sm:$0xff]  }
 0x115   : > { %1821 = vmatprep.subr.bf16.mxu0 %v4302_v29  ;;  %1985 = vmatprep.subr.bf16.mxu1 %v4305_v30  ;;  %v4390_v29 = vld [vmem:[#allocation2 + $0x160] ss:$16 sps:$4 sm:$0xff]   ;;  %v4393_v30 = vld [vmem:[#allocation2 + $0x168] ss:$16 sps:$4 sm:$0xff]  }
 0x118   : > { %1822 = vmatpush1.bf16.msra.mxu0 %v4300_v31  ;;  %1986 = vmatpush1.bf16.msra.mxu1 %v4303_v32  ;;  %v4398_v31 = vld [vmem:[#allocation2 + $0x184] ss:$16 sps:$4 sm:$0xff]   ;;  %v4401_v32 = vld [vmem:[#allocation2 + $0x18c] ss:$16 sps:$4 sm:$0xff]  }
 0x119   : > { %1823 = vmatprep.subr.bf16.mxu0 %v4308_v33  ;;  %1987 = vmatprep.subr.bf16.mxu1 %v4311_v34  ;;  %v4396_v33 = vld [vmem:[#allocation2 + $0x180] ss:$16 sps:$4 sm:$0xff]   ;;  %v4399_v34 = vld [vmem:[#allocation2 + $0x188] ss:$16 sps:$4 sm:$0xff]  }
 0x11c   : > { %1824 = vmatpush1.bf16.msra.mxu0 %v4306_v35  ;;  %1988 = vmatpush1.bf16.msra.mxu1 %v4309_v36  ;;  %v4404_v35 = vld [vmem:[#allocation2 + $0x1a4] ss:$16 sps:$4 sm:$0xff]   ;;  %v4407_v36 = vld [vmem:[#allocation2 + $0x1ac] ss:$16 sps:$4 sm:$0xff]  }
 0x11d   : > { %1825 = vmatprep.subr.bf16.mxu0 %v4314_v37  ;;  %1989 = vmatprep.subr.bf16.mxu1 %v4317_v38  ;;  %v4402_v37 = vld [vmem:[#allocation2 + $0x1a0] ss:$16 sps:$4 sm:$0xff]   ;;  %v4405_v38 = vld [vmem:[#allocation2 + $0x1a8] ss:$16 sps:$4 sm:$0xff]  }
 0x120   : > { %1826 = vmatpush1.bf16.msra.mxu0 %v4312_v39  ;;  %1990 = vmatpush1.bf16.msra.mxu1 %v4315_v40  ;;  %v4410_v39 = vld [vmem:[#allocation2 + $0x1c4] ss:$16 sps:$4 sm:$0xff]   ;;  %v4413_v40 = vld [vmem:[#allocation2 + $0x1cc] ss:$16 sps:$4 sm:$0xff]  }
 0x121   : > { %1827 = vmatprep.subr.bf16.mxu0 %v4320_v41  ;;  %1991 = vmatprep.subr.bf16.mxu1 %v4323_v42  ;;  %v4408_v41 = vld [vmem:[#allocation2 + $0x1c0] ss:$16 sps:$4 sm:$0xff]   ;;  %v4411_v42 = vld [vmem:[#allocation2 + $0x1c8] ss:$16 sps:$4 sm:$0xff]  }
 0x124   : > { %1828 = vmatpush1.bf16.msra.mxu0 %v4318_v43  ;;  %1992 = vmatpush1.bf16.msra.mxu1 %v4321_v44  ;;  %v4416_v43 = vld [vmem:[#allocation2 + $0x1e4] ss:$16 sps:$4 sm:$0xff]   ;;  %v4419_v44 = vld [vmem:[#allocation2 + $0x1ec] ss:$16 sps:$4 sm:$0xff]  }
 0x125   : > { %2840 = vmatprep.subr.bf16.mxu0 %v4326_v46  ;;  %2922 = vmatprep.subr.bf16.mxu1 %v4329_v47  ;;  %v4417_v46 = vld [vmem:[#allocation2 + $0x1e8] ss:$16 sps:$4 sm:$0xff]   ;;  %v4422_v47 = vld [vmem:[#allocation2 + $0x204] ss:$16 sps:$4 sm:$0xff]  }
 0x127   : > { %1846 = vmatmul.mubr.bf16.vlgmr.msra.gmra.mrb[0].mxu0 %v323_v50  ;;  %2010 = vmatmul.mubr.bf16.vlgmr.msra.gmra.mrb[0].mxu1 %v323_v50 }
 0x128   : > { %2841 = vmatpush1.bf16.msra.mxu0 %v4324_v48  ;;  %2923 = vmatpush1.bf16.msra.mxu1 %v4327_v49  ;;  %v4425_v48 = vld [vmem:[#allocation2 + $0x20c] ss:$16 sps:$4 sm:$0xff]   ;;  %v550_v49 = vlaneseq }
 0x129   : > { %2842 = vmatprep.subr.bf16.mxu0 %v4332_v51  ;;  %2924 = vmatprep.subr.bf16.mxu1 %v4335_v52  ;;  %v5478_v52 = vld [vmem:[%s5525_s2] sm:$0xf] }
 0x12a   : > { %v5472_v50 = vshrl.u32 %v550_v49, 7 }
 0x12c   : > { %2843 = vmatpush1.bf16.msra.mxu0 %v4330_v53  ;;  %2925 = vmatpush1.bf16.msra.mxu1 %v4333_v54  ;;  %v552_v51 = vsub.s32 0, %v5472_v50  ;;  %v556_v53 = vsub.s32 1, %v5472_v50  ;;  %v564_v54 = vsub.s32 3, %v5472_v50 }
 0x12d   : > { %2844 = vmatprep.subr.bf16.mxu0 %v4338_v55  ;;  %2926 = vmatprep.subr.bf16.mxu1 %v4341_v56 }
 0x12e   : > { %v553_v55 = vrot.slane %v5478_v52, %v552_v51  ;;  %v557_v56 = vrot.slane %v5478_v52, %v556_v53 }
 0x130   : > { %2845 = vmatpush1.bf16.msra.mxu0 %v4336_v57  ;;  %2927 = vmatpush1.bf16.msra.mxu1 %v4339_v58  ;;  %v565_v57 = vrot.slane %v5478_v52, %v564_v54 }
 0x131   : > { %2846 = vmatprep.subr.bf16.mxu0 %v4344_v59  ;;  %2928 = vmatprep.subr.bf16.mxu1 %v4347_v60 }
 0x134   : > { %2847 = vmatpush1.bf16.msra.mxu0 %v4342_v61  ;;  %2929 = vmatpush1.bf16.msra.mxu1 %v4345_v62 }
 0x135   : > { %2848 = vmatprep.subr.bf16.mxu0 %v4350_v63  ;;  %2930 = vmatprep.subr.bf16.mxu1 %v4353_v0 }
 0x138   : > { %2849 = vmatpush1.bf16.msra.mxu0 %v4348_v1  ;;  %2931 = vmatpush1.bf16.msra.mxu1 %v4351_v2 }
 0x139   : > { %2850 = vmatprep.subr.bf16.mxu0 %v4356_v3  ;;  %2932 = vmatprep.subr.bf16.mxu1 %v4359_v4 }
 0x13c   : > { %2851 = vmatpush1.bf16.msra.mxu0 %v4354_v5  ;;  %2933 = vmatpush1.bf16.msra.mxu1 %v4357_v6 }
 0x13d   : > { %2852 = vmatprep.subr.bf16.mxu0 %v4362_v7  ;;  %2934 = vmatprep.subr.bf16.mxu1 %v4365_v8 }
 0x140   : > { %2853 = vmatpush1.bf16.msra.mxu0 %v4360_v9  ;;  %2935 = vmatpush1.bf16.msra.mxu1 %v4363_v10 }
 0x141   : > { %2854 = vmatprep.subr.bf16.mxu0 %v4368_v11  ;;  %2936 = vmatprep.subr.bf16.mxu1 %v4371_v12 }
 0x144   : > { %2855 = vmatpush1.bf16.msra.mxu0 %v4366_v13  ;;  %2937 = vmatpush1.bf16.msra.mxu1 %v4369_v14 }
 0x145   : > { %2856 = vmatprep.subr.bf16.mxu0 %v4374_v15  ;;  %2938 = vmatprep.subr.bf16.mxu1 %v4377_v16 }
 0x148   : > { %2857 = vmatpush1.bf16.msra.mxu0 %v4372_v17  ;;  %2939 = vmatpush1.bf16.msra.mxu1 %v4375_v18 }
 0x149   : > { %2858 = vmatprep.subr.bf16.mxu0 %v4380_v19  ;;  %2940 = vmatprep.subr.bf16.mxu1 %v4383_v20 }
 0x14c   : > { %2859 = vmatpush1.bf16.msra.mxu0 %v4378_v21  ;;  %2941 = vmatpush1.bf16.msra.mxu1 %v4381_v22  ;;  %v4420_v21 = vld [vmem:[#allocation2 + $0x200] ss:$16 sps:$4 sm:$0xff]   ;;  %v4423_v22 = vld [vmem:[#allocation2 + $0x208] ss:$16 sps:$4 sm:$0xff]  }
 0x14d   : > { %2860 = vmatprep.subr.bf16.mxu0 %v4386_v23  ;;  %2942 = vmatprep.subr.bf16.mxu1 %v4389_v24  ;;  %v4428_v24 = vld [vmem:[#allocation2 + $0x224] ss:$16 sps:$4 sm:$0xff]  }
 0x150   : > { %2861 = vmatpush1.bf16.msra.mxu0 %v4384_v25  ;;  %2943 = vmatpush1.bf16.msra.mxu1 %v4387_v26  ;;  %v4431_v25 = vld [vmem:[#allocation2 + $0x22c] ss:$16 sps:$4 sm:$0xff]  }
 0x151   : > { %2862 = vmatprep.subr.bf16.mxu0 %v4392_v27  ;;  %2944 = vmatprep.subr.bf16.mxu1 %v4395_v28  ;;  %v4426_v27 = vld [vmem:[#allocation2 + $0x220] ss:$16 sps:$4 sm:$0xff]   ;;  %v4429_v28 = vld [vmem:[#allocation2 + $0x228] ss:$16 sps:$4 sm:$0xff]  }
 0x154   : > { %2863 = vmatpush1.bf16.msra.mxu0 %v4390_v29  ;;  %2945 = vmatpush1.bf16.msra.mxu1 %v4393_v30  ;;  %v4434_v29 = vld [vmem:[#allocation2 + $0x244] ss:$16 sps:$4 sm:$0xff]   ;;  %v4437_v30 = vld [vmem:[#allocation2 + $0x24c] ss:$16 sps:$4 sm:$0xff]  }
 0x155   : > { %2864 = vmatprep.subr.bf16.mxu0 %v4398_v31  ;;  %2946 = vmatprep.subr.bf16.mxu1 %v4401_v32  ;;  %v4432_v31 = vld [vmem:[#allocation2 + $0x240] ss:$16 sps:$4 sm:$0xff]   ;;  %v4435_v32 = vld [vmem:[#allocation2 + $0x248] ss:$16 sps:$4 sm:$0xff]  }
 0x158   : > { %2865 = vmatpush1.bf16.msra.mxu0 %v4396_v33  ;;  %2947 = vmatpush1.bf16.msra.mxu1 %v4399_v34  ;;  %v4440_v33 = vld [vmem:[#allocation2 + $0x264] ss:$16 sps:$4 sm:$0xff]   ;;  %v4443_v34 = vld [vmem:[#allocation2 + $0x26c] ss:$16 sps:$4 sm:$0xff]  }
 0x159   : > { %2866 = vmatprep.subr.bf16.mxu0 %v4404_v35  ;;  %2948 = vmatprep.subr.bf16.mxu1 %v4407_v36  ;;  %v4438_v35 = vld [vmem:[#allocation2 + $0x260] ss:$16 sps:$4 sm:$0xff]   ;;  %v4441_v36 = vld [vmem:[#allocation2 + $0x268] ss:$16 sps:$4 sm:$0xff]  }
 0x15c   : > { %2867 = vmatpush1.bf16.msra.mxu0 %v4402_v37  ;;  %2949 = vmatpush1.bf16.msra.mxu1 %v4405_v38  ;;  %v4446_v37 = vld [vmem:[#allocation2 + $0x284] ss:$16 sps:$4 sm:$0xff]   ;;  %v4449_v38 = vld [vmem:[#allocation2 + $0x28c] ss:$16 sps:$4 sm:$0xff]  }
 0x15d   : > { %2868 = vmatprep.subr.bf16.mxu0 %v4410_v39  ;;  %2950 = vmatprep.subr.bf16.mxu1 %v4413_v40  ;;  %v560_v39 = vsub.s32 2, %v5472_v50  ;;  %v4444_v40 = vld [vmem:[#allocation2 + $0x280] ss:$16 sps:$4 sm:$0xff]  }
 0x160   : > { %2869 = vmatpush1.bf16.msra.mxu0 %v4408_v41  ;;  %2951 = vmatpush1.bf16.msra.mxu1 %v4411_v42  ;;  %v4447_v41 = vld [vmem:[#allocation2 + $0x288] ss:$16 sps:$4 sm:$0xff]   ;;  %v4452_v42 = vld [vmem:[#allocation2 + $0x2a4] ss:$16 sps:$4 sm:$0xff]  }
 0x161   : > { %2870 = vmatprep.subr.bf16.mxu0 %v4416_v43  ;;  %2952 = vmatprep.subr.bf16.mxu1 %v4419_v44  ;;  %v4455_v43 = vld [vmem:[#allocation2 + $0x2ac] ss:$16 sps:$4 sm:$0xff]   ;;  %v561_v44 = vrot.slane %v5478_v52, %v560_v39 }
 0x164   : > { %2871 = vmatpush1.bf16.msra.mxu0 %v4414_v45  ;;  %2953 = vmatpush1.bf16.msra.mxu1 %v4417_v46  ;;  %v4450_v45 = vld [vmem:[#allocation2 + $0x2a0] ss:$16 sps:$4 sm:$0xff]   ;;  %v4453_v46 = vld [vmem:[#allocation2 + $0x2a8] ss:$16 sps:$4 sm:$0xff]  }
 0x165   : > { %2881 = vmatprep.subr.bf16.mxu0 %v4422_v47  ;;  %2963 = vmatprep.subr.bf16.mxu1 %v4425_v48  ;;  %v4458_v47 = vld [vmem:[#allocation2 + $0x2c4] ss:$16 sps:$4 sm:$0xff]   ;;  %v4461_v48 = vld [vmem:[#allocation2 + $0x2cc] ss:$16 sps:$4 sm:$0xff]  }
 0x1fa   : > { %v1847_v58 = vpop.f32.mrb[0].mxu0  ;;  %v5491_v59 = vpop.f32.mrb[0].mxu1 }
 0x1fb   : > { %v3913_v60 = vadd.f32 %v1847_v58, %v553_v55  ;;  %v1849_v61 = vpop.f32.mrb[1].mxu0  ;;  %v2013_v62 = vpop.f32.mrb[1].mxu1  ;;  %v5498_v49 = vadd.f32 %v5491_v59, %v561_v44  ;;  %v4456_v55 = vld [vmem:[#allocation2 + $0x2c0] ss:$16 sps:$4 sm:$0xff]   ;;  %v4467_v58 = vld [vmem:[#allocation2 + $0x2ec] ss:$16 sps:$4 sm:$0xff]  }
 0x1fc   : > { %v3914_v63 = vadd.f32 %v1849_v61, %v557_v56  ;;  %v3916_v0 = vadd.f32 %v2013_v62, %v565_v57  ;;  %v1851_v1 = vpop.f32.mrb[2].mxu0  ;;  %v2015_v2 = vpop.f32.mrb[2].mxu1  ;;  %v4459_v56 = vld [vmem:[#allocation2 + $0x2c8] ss:$16 sps:$4 sm:$0xff]   ;;  %v4464_v57 = vld [vmem:[#allocation2 + $0x2e4] ss:$16 sps:$4 sm:$0xff]  }
 0x1fd   : > { %v3697_v3 = vmul.f32 -1.442695, %v3913_v60  ;;  %v1852_v4 = vpop.f32.mrb[3].mxu0  ;;  %v2016_v5 = vpop.f32.mrb[3].mxu1  ;;  %v3699_v52 = vmul.f32 -1.442695, %v5498_v49 }
 0x1fe   : > { %v3698_v6 = vmul.f32 -1.442695, %v3914_v63  ;;  %v3700_v7 = vmul.f32 -1.442695, %v3916_v0  ;;  %v4465_v61 = vld [vmem:[#allocation2 + $0x2e8] ss:$16 sps:$4 sm:$0xff]  }
 0x1ff   : > { %4548 = vpow2.f32 %v3697_v3  ;;  %v4470_v62 = vld [vmem:[#allocation2 + $0x304] ss:$16 sps:$4 sm:$0xff]   ;;  %v4468_v59 = vld [vmem:[#allocation2 + $0x300] ss:$16 sps:$4 sm:$0xff]   ;;  %v4479_v2 = vld [vmem:[#allocation2 + $0x32c] ss:$16 sps:$4 sm:$0xff]  }
 0x200   : > { %4550 = vpow2.f32 %v3698_v6  ;;  %v4476_v1 = vld [vmem:[#allocation2 + $0x324] ss:$16 sps:$4 sm:$0xff]   ;;  %v4474_v3 = vld [vmem:[#allocation2 + $0x320] ss:$16 sps:$4 sm:$0xff]   ;;  %v4477_v4 = vld [vmem:[#allocation2 + $0x328] ss:$16 sps:$4 sm:$0xff]  }
 0x201   : > { %4552 = vpow2.f32 %v3700_v7  ;;  %v4482_v5 = vld [vmem:[#allocation2 + $0x344] ss:$16 sps:$4 sm:$0xff]   ;;  %v4485_v6 = vld [vmem:[#allocation2 + $0x34c] ss:$16 sps:$4 sm:$0xff]   ;;  %v4480_v7 = vld [vmem:[#allocation2 + $0x340] ss:$16 sps:$4 sm:$0xff]  }
 0x202   : > { %v4525_v44 = vld [vmem:[#allocation4 + $0xd0] sm:$0xff]  }
 0x209   : > { %v4549_v8 = vpop.eup %4548 }
 0x20a   : > { %v2030_v9 = vadd.f32 1.0, %v4549_v8  ;;  %v4551_v10 = vpop.eup %4550  ;;  %v4483_v8 = vld [vmem:[#allocation2 + $0x348] ss:$16 sps:$4 sm:$0xff]  }
 0x20b   : > { %v4553_v11 = vpop.eup %4552  ;;  %v2031_v12 = vadd.f32 1.0, %v4551_v10  ;;  %v4488_v10 = vld [vmem:[#allocation2 + $0x364] ss:$16 sps:$4 sm:$0xff]  }
 0x20c   : > { %4554 = vrcp.f32 %v2030_v9  ;;  %v2033_v13 = vadd.f32 1.0, %v4553_v11  ;;  %v4491_v11 = vld [vmem:[#allocation2 + $0x36c] ss:$16 sps:$4 sm:$0xff]  }
 0x20d   : > { %4556 = vrcp.f32 %v2031_v12 }
 0x20e   : > { %4558 = vrcp.f32 %v2033_v13  ;;  %v4486_v13 = vld [vmem:[#allocation2 + $0x360] ss:$16 sps:$4 sm:$0xff]  }
 0x20f   : > { %4560 = vpow2.f32 %v3699_v52  ;;  %v4535_v52 = vld [vmem:[#allocation4 + $0xa0] sm:$0xff]  }
 0x216   : > { %v4555_v14 = vpop.eup %4554 }
 0x217   : > { %v4557_v15 = vpop.eup %4556  ;;  %v2042_v16 = vmul.f32 %v4555_v14, %v3913_v60  ;;  %v4462_v60 = vld [vmem:[#allocation2 + $0x2e0] ss:$16 sps:$4 sm:$0xff]   ;;  %v4489_v14 = vld [vmem:[#allocation2 + $0x368] ss:$16 sps:$4 sm:$0xff]  }
 0x218   : > { %v4559_v17 = vpop.eup %4558  ;;  %v2043_v18 = vmul.f32 %v4557_v15, %v3914_v63  ;;  %v4473_v63 = vld [vmem:[#allocation2 + $0x30c] ss:$16 sps:$4 sm:$0xff]   ;;  %v4494_v15 = vld [vmem:[#allocation2 + $0x384] ss:$16 sps:$4 sm:$0xff]  }
 0x219   : > { %v2045_v19 = vmul.f32 %v4559_v17, %v3916_v0  ;;  %v2046_v23 = vpack.c.bf16 %v2042_v16, %v2042_v16  ;;  %v4471_v0 = vld [vmem:[#allocation2 + $0x308] ss:$16 sps:$4 sm:$0xff]   ;;  %v4561_v9 = vpop.eup %4560  ;;  %v4497_v16 = vld [vmem:[#allocation2 + $0x38c] ss:$16 sps:$4 sm:$0xff]   ;;  %v4492_v17 = vld [vmem:[#allocation2 + $0x380] ss:$16 sps:$4 sm:$0xff]  }
 0x21a   : > { %v2047_v20 = vpack.c.bf16 %v2043_v18, %v2043_v18  ;;  %v2032_v12 = vadd.f32 1.0, %v4561_v9  ;;  %v4495_v18 = vld [vmem:[#allocation2 + $0x388] ss:$16 sps:$4 sm:$0xff]  }
 0x21b   : > { %v2049_v26 = vpack.c.bf16 %v2045_v19, %v2045_v19  ;;  %v4500_v19 = vld [vmem:[#allocation2 + $0x3a4] ss:$16 sps:$4 sm:$0xff]  }
 0x21c   : > { %2872 = vmatprep.mubr.bf16.mxu0 %v2047_v20  ;;  %2954 = vmatprep.mubr.bf16.mxu1 %v2047_v20  ;;  %4562 = vrcp.f32 %v2032_v12  ;;  %v4503_v20 = vld [vmem:[#allocation2 + $0x3ac] ss:$16 sps:$4 sm:$0xff]  }
 0x21d   : > { %2873 = vmatmul.mubr.bf16.vlgmr.msra.gmra.mrb[4].mxu0 %v2046_v23  ;;  %2955 = vmatmul.mubr.bf16.vlgmr.msra.gmra.mrb[4].mxu1 %v2046_v23  ;;  %v4506_v23 = vld [vmem:[#allocation2 + $0x3c4] ss:$16 sps:$4 sm:$0xff]  }
 0x21e   : > { %2882 = vmatpush1.bf16.msra.mxu0 %v4420_v21  ;;  %2964 = vmatpush1.bf16.msra.mxu1 %v4423_v22  ;;  %v4498_v21 = vld [vmem:[#allocation2 + $0x3a0] ss:$16 sps:$4 sm:$0xff]   ;;  %v4501_v22 = vld [vmem:[#allocation2 + $0x3a8] ss:$16 sps:$4 sm:$0xff]  }
 0x21f   : > { %2913 = vmatprep.mubr.bf16.mxu0 %v2049_v26  ;;  %2995 = vmatprep.mubr.bf16.mxu1 %v2049_v26  ;;  %v4507_v26 = vld [vmem:[#allocation2 + $0x3c8] ss:$16 sps:$4 sm:$0xff]  }
 0x220   : > { %2883 = vmatprep.subr.bf16.mxu0 %v4428_v24  ;;  %2965 = vmatprep.subr.bf16.mxu1 %v4431_v25  ;;  %v4509_v24 = vld [vmem:[#allocation2 + $0x3cc] ss:$16 sps:$4 sm:$0xff]   ;;  %v4504_v25 = vld [vmem:[#allocation2 + $0x3c0] ss:$16 sps:$4 sm:$0xff]  }
 0x222   : > { %2884 = vmatpush1.bf16.msra.mxu0 %v4426_v27  ;;  %2966 = vmatpush1.bf16.msra.mxu1 %v4429_v28  ;;  %v4512_v27 = vld [vmem:[#allocation2 + $0x3e4] ss:$16 sps:$4 sm:$0xff]   ;;  %v4515_v28 = vld [vmem:[#allocation2 + $0x3ec] ss:$16 sps:$4 sm:$0xff]  }
 0x223   : > { %2885 = vmatprep.subr.bf16.mxu0 %v4434_v29  ;;  %2967 = vmatprep.subr.bf16.mxu1 %v4437_v30  ;;  %v4510_v30 = vld [vmem:[#allocation2 + $0x3e0] ss:$16 sps:$4 sm:$0xff]  }
 0x226   : > { %2886 = vmatpush1.bf16.msra.mxu0 %v4432_v31  ;;  %2968 = vmatpush1.bf16.msra.mxu1 %v4435_v32  ;;  %v4563_v29 = vpop.eup %4562  ;;  %v4513_v31 = vld [vmem:[#allocation2 + $0x3e8] ss:$16 sps:$4 sm:$0xff]  }
 0x227   : > { %2887 = vmatprep.subr.bf16.mxu0 %v4440_v33  ;;  %2969 = vmatprep.subr.bf16.mxu1 %v4443_v34  ;;  %v2044_v32 = vmul.f32 %v4563_v29, %v5498_v49  ;;  %v4516_v34 = vld [vmem:[#allocation4 + $0x40] sm:$0xff]   ;;  %v4530_v49 = vld [vmem:[#allocation4 + $0x18] sm:$0xff]  }
 0x229   : > { %v2048_v33 = vpack.c.bf16 %v2044_v32, %v2044_v32 }
 0x22a   : > { %2888 = vmatpush1.bf16.msra.mxu0 %v4438_v35  ;;  %2970 = vmatpush1.bf16.msra.mxu1 %v4441_v36  ;;  %v4517_v35 = vld [vmem:[#allocation4 + $0xc0] sm:$0xff]  }
 0x22b   : > { %2889 = vmatprep.subr.bf16.mxu0 %v4446_v37  ;;  %2971 = vmatprep.subr.bf16.mxu1 %v4449_v38  ;;  %v4518_v36 = vld [vmem:[#allocation4] sm:$0xff]   ;;  %v4520_v38 = vld [vmem:[#allocation4 + $0x48] sm:$0xff]  }
 0x22c   : > { %v4519_v37 = vld [vmem:[#allocation4 + $0x80] sm:$0xff]  }
 0x22e   : > { %2890 = vmatpush1.bf16.msra.mxu0 %v4444_v40  ;;  %2972 = vmatpush1.bf16.msra.mxu1 %v4447_v41  ;;  %v4521_v40 = vld [vmem:[#allocation4 + $0xc8] sm:$0xff]  }
 0x22f   : > { %2891 = vmatprep.subr.bf16.mxu0 %v4452_v42  ;;  %2973 = vmatprep.subr.bf16.mxu1 %v4455_v43  ;;  %v4522_v41 = vld [vmem:[#allocation4 + $0x8] sm:$0xff]   ;;  %v4524_v43 = vld [vmem:[#allocation4 + $0x50] sm:$0xff]  }
 0x230   : > { %v4523_v42 = vld [vmem:[#allocation4 + $0x88] sm:$0xff]  }
 0x232   : > { %2892 = vmatpush1.bf16.msra.mxu0 %v4450_v45  ;;  %2974 = vmatpush1.bf16.msra.mxu1 %v4453_v46  ;;  %v4526_v45 = vld [vmem:[#allocation4 + $0x10] sm:$0xff]  }
 0x233   : > { %2893 = vmatprep.subr.bf16.mxu0 %v4458_v47  ;;  %2975 = vmatprep.subr.bf16.mxu1 %v4461_v48  ;;  %v4527_v46 = vld [vmem:[#allocation4 + $0x90] sm:$0xff]   ;;  %v4528_v47 = vld [vmem:[#allocation4 + $0x58] sm:$0xff]  }
 0x234   : > { %v4529_v48 = vld [vmem:[#allocation4 + $0xd8] sm:$0xff]  }
 0x236   : > { %2894 = vmatpush1.bf16.msra.mxu0 %v4456_v55  ;;  %2976 = vmatpush1.bf16.msra.mxu1 %v4459_v56  ;;  %v4531_v55 = vld [vmem:[#allocation4 + $0x98] sm:$0xff]   ;;  %v4532_v56 = vld [vmem:[#allocation4 + $0x60] sm:$0xff]  }
 0x237   : > { %2895 = vmatprep.subr.bf16.mxu0 %v4464_v57  ;;  %2977 = vmatprep.subr.bf16.mxu1 %v4467_v58  ;;  %v4533_v57 = vld [vmem:[#allocation4 + $0xe0] sm:$0xff]  }
 0x238   : > { %v4534_v58 = vld [vmem:[#allocation4 + $0x20] sm:$0xff]  }
 0x23a   : > { %2896 = vmatpush1.bf16.msra.mxu0 %v4462_v60  ;;  %2978 = vmatpush1.bf16.msra.mxu1 %v4465_v61  ;;  %v4536_v60 = vld [vmem:[#allocation4 + $0x68] sm:$0xff]  }
 0x23b   : > { %2897 = vmatprep.subr.bf16.mxu0 %v4470_v62  ;;  %2979 = vmatprep.subr.bf16.mxu1 %v4473_v63  ;;  %v4537_v61 = vld [vmem:[#allocation4 + $0xe8] sm:$0xff]  }
 0x23c   : > { %v4538_v62 = vld [vmem:[#allocation4 + $0x28] sm:$0xff]  }
 0x23d   : > { %v4539_v63 = vld [vmem:[#allocation4 + $0xa8] sm:$0xff]  }
 0x23e   : > { %2898 = vmatpush1.bf16.msra.mxu0 %v4468_v59  ;;  %2980 = vmatpush1.bf16.msra.mxu1 %v4471_v0  ;;  %v4540_v59 = vld [vmem:[#allocation4 + $0x70] sm:$0xff]  }
 0x23f   : > { %2899 = vmatprep.subr.bf16.mxu0 %v4476_v1  ;;  %2981 = vmatprep.subr.bf16.mxu1 %v4479_v2  ;;  %v4541_v0 = vld [vmem:[#allocation4 + $0xf0] sm:$0xff]  }
 0x240   : > { %v4542_v1 = vld [vmem:[#allocation4 + $0x30] sm:$0xff]  }
 0x241   : > { %v4543_v2 = vld [vmem:[#allocation4 + $0xb0] sm:$0xff]  }
 0x242   : > { %2900 = vmatpush1.bf16.msra.mxu0 %v4474_v3  ;;  %2982 = vmatpush1.bf16.msra.mxu1 %v4477_v4  ;;  %v4544_v3 = vld [vmem:[#allocation4 + $0x78] sm:$0xff]  }
 0x243   : > { %2901 = vmatprep.subr.bf16.mxu0 %v4482_v5  ;;  %2983 = vmatprep.subr.bf16.mxu1 %v4485_v6  ;;  %v4545_v4 = vld [vmem:[#allocation4 + $0xf8] sm:$0xff]  }
 0x244   : > { %v4546_v5 = vld [vmem:[#allocation4 + $0x38] sm:$0xff]  }
 0x245   : > { %v4547_v6 = vld [vmem:[#allocation4 + $0xb8] sm:$0xff]  }
 0x246   : > { %2902 = vmatpush1.bf16.msra.mxu0 %v4480_v7  ;;  %2984 = vmatpush1.bf16.msra.mxu1 %v4483_v8  ;;  %v2178_v7 = vld [vmem:[%s5527_s4] sm:$0xf] }
 0x247   : > { %2903 = vmatprep.subr.bf16.mxu0 %v4488_v10  ;;  %2985 = vmatprep.subr.bf16.mxu1 %v4491_v11  ;;  %v2183_v8 = vrot.slane %v2178_v7, %v552_v51  ;;  %v2191_v9 = vrot.slane %v2178_v7, %v560_v39  ;;  %v2187_v10 = vrot.slane %v2178_v7, %v556_v53 }
 0x248   : > { %v2195_v11 = vrot.slane %v2178_v7, %v564_v54 }
 0x24a   : > { %2904 = vmatpush1.bf16.msra.mxu0 %v4486_v13  ;;  %2986 = vmatpush1.bf16.msra.mxu1 %v4489_v14 }
 0x24b   : > { %2905 = vmatprep.subr.bf16.mxu0 %v4494_v15  ;;  %2987 = vmatprep.subr.bf16.mxu1 %v4497_v16 }
 0x24e   : > { %2906 = vmatpush1.bf16.msra.mxu0 %v4492_v17  ;;  %2988 = vmatpush1.bf16.msra.mxu1 %v4495_v18 }
 0x24f   : > { %2907 = vmatprep.subr.bf16.mxu0 %v4500_v19  ;;  %2989 = vmatprep.subr.bf16.mxu1 %v4503_v20 }
 0x252   : > { %2908 = vmatpush1.bf16.msra.mxu0 %v4498_v21  ;;  %2990 = vmatpush1.bf16.msra.mxu1 %v4501_v22 }
 0x253   : > { %2909 = vmatprep.subr.bf16.mxu0 %v4506_v23  ;;  %2991 = vmatprep.subr.bf16.mxu1 %v4509_v24 }
 0x256   : > { %2910 = vmatpush1.bf16.msra.mxu0 %v4504_v25  ;;  %2992 = vmatpush1.bf16.msra.mxu1 %v4507_v26 }
 0x257   : > { %2911 = vmatprep.subr.bf16.mxu0 %v4512_v27  ;;  %2993 = vmatprep.subr.bf16.mxu1 %v4515_v28 }
 0x25a   : > { %2912 = vmatpush1.bf16.msra.mxu0 %v4510_v30  ;;  %2994 = vmatpush1.bf16.msra.mxu1 %v4513_v31 }
 0x25b   : > { %3869 = vmatprep.subr.bf16.mxu0 %v4516_v34  ;;  %3891 = vmatprep.subr.bf16.mxu1 %v4517_v35 }
 0x25d   : > { %2914 = vmatmul.mubr.bf16.vlgmr.msra.gmra.mrb[4].mxu0 %v2048_v33  ;;  %2996 = vmatmul.mubr.bf16.vlgmr.msra.gmra.mrb[4].mxu1 %v2048_v33 }
 0x25e   : > { %3870 = vmatpush3.bf16.msra.mxu0 %v4518_v36  ;;  %3892 = vmatpush3.bf16.msra.mxu1 %v4519_v37 }
 0x25f   : > { %3871 = vmatprep.subr.bf16.mxu0 %v4520_v38  ;;  %3893 = vmatprep.subr.bf16.mxu1 %v4521_v40 }
 0x262   : > { %3872 = vmatpush3.bf16.msra.mxu0 %v4522_v41  ;;  %3894 = vmatpush3.bf16.msra.mxu1 %v4523_v42 }
 0x263   : > { %3873 = vmatprep.subr.bf16.mxu0 %v4524_v43  ;;  %3895 = vmatprep.subr.bf16.mxu1 %v4525_v44 }
 0x266   : > { %3874 = vmatpush3.bf16.msra.mxu0 %v4526_v45  ;;  %3896 = vmatpush3.bf16.msra.mxu1 %v4527_v46  ;;  %v3833_v46 = vld [vmem:[%s5529_s6] ss:$0 sm:$0xff] }
 0x267   : > { %3875 = vmatprep.subr.bf16.mxu0 %v4528_v47  ;;  %3897 = vmatprep.subr.bf16.mxu1 %v4529_v48 }
 0x26a   : > { %3876 = vmatpush3.bf16.msra.mxu0 %v4530_v49  ;;  %3898 = vmatpush3.bf16.msra.mxu1 %v4531_v55 }
 0x26b   : > { %3877 = vmatprep.subr.bf16.mxu0 %v4532_v56  ;;  %3899 = vmatprep.subr.bf16.mxu1 %v4533_v57 }
 0x26e   : > { %3878 = vmatpush3.bf16.msra.mxu0 %v4534_v58  ;;  %3900 = vmatpush3.bf16.msra.mxu1 %v4535_v52 }
 0x26f   : > { %3879 = vmatprep.subr.bf16.mxu0 %v4536_v60  ;;  %3901 = vmatprep.subr.bf16.mxu1 %v4537_v61 }
 0x272   : > { %3880 = vmatpush3.bf16.msra.mxu0 %v4538_v62  ;;  %3902 = vmatpush3.bf16.msra.mxu1 %v4539_v63 }
 0x273   : > { %3881 = vmatprep.subr.bf16.mxu0 %v4540_v59  ;;  %3903 = vmatprep.subr.bf16.mxu1 %v4541_v0 }
 0x276   : > { %3882 = vmatpush3.bf16.msra.mxu0 %v4542_v1  ;;  %3904 = vmatpush3.bf16.msra.mxu1 %v4543_v2 }
 0x277   : > { %3883 = vmatprep.subr.bf16.mxu0 %v4544_v3  ;;  %3905 = vmatprep.subr.bf16.mxu1 %v4545_v4 }
 0x27a   : > { %3884 = vmatpush3.bf16.msra.mxu0 %v4546_v5  ;;  %3906 = vmatpush3.bf16.msra.mxu1 %v4547_v6 }
 0x330   : > { %v2915_v12 = vpop.f32.mrb[4].mxu0  ;;  %v2997_v13 = vpop.f32.mrb[4].mxu1 }
 0x331   : > { %v3917_v14 = vadd.f32 %v2915_v12, %v2183_v8  ;;  %v3919_v15 = vadd.f32 %v2997_v13, %v2191_v9  ;;  %v2917_v16 = vpop.f32.mrb[5].mxu0  ;;  %v2999_v17 = vpop.f32.mrb[5].mxu1 }
 0x332   : > { %v3918_v18 = vadd.f32 %v2917_v16, %v2187_v10  ;;  %v3920_v19 = vadd.f32 %v2999_v17, %v2195_v11  ;;  %v2919_v20 = vpop.f32.mrb[6].mxu0  ;;  %v3001_v21 = vpop.f32.mrb[6].mxu1 }
 0x333   : > { %v3829_v51 = vmul.f32 -1.442695, %v3917_v14  ;;  %v3831_v22 = vmul.f32 -1.442695, %v3919_v15  ;;  %v2920_v23 = vpop.f32.mrb[7].mxu0  ;;  %v3002_v39 = vpop.f32.mrb[7].mxu1 }
 0x334   : > { %v3830_v24 = vmul.f32 -1.442695, %v3918_v18  ;;  %v3832_v25 = vmul.f32 -1.442695, %v3920_v19 }
 0x335   : > { %4564 = vpow2.f32 %v3829_v51 }
 0x336   : > { %4566 = vpow2.f32 %v3831_v22 }
 0x337   : > { %4568 = vpow2.f32 %v3830_v24 }
 0x338   : > { %4570 = vpow2.f32 %v3832_v25 }
 0x33f   : > { %v4565_v50 = vpop.eup %4564 }
 0x340   : > { %v4567_v53 = vpop.eup %4566  ;;  %v3016_v54 = vadd.f32 1.0, %v4565_v50 }
 0x341   : > { %v4569_v26 = vpop.eup %4568  ;;  %v3018_v27 = vadd.f32 1.0, %v4567_v53 }
 0x342   : > { %v4571_v28 = vpop.eup %4570  ;;  %4572 = vrcp.f32 %v3016_v54  ;;  %v3017_v29 = vadd.f32 1.0, %v4569_v26 }
 0x343   : > { %4574 = vrcp.f32 %v3018_v27  ;;  %v3019_v30 = vadd.f32 1.0, %v4571_v28 }
 0x344   : > { %4576 = vrcp.f32 %v3017_v29 }
 0x345   : > { %4578 = vrcp.f32 %v3019_v30 }
 0x34c   : > { %v4573_v31 = vpop.eup %4572 }
 0x34d   : > { %v4575_v32 = vpop.eup %4574  ;;  %v3028_v34 = vmul.f32 %v4573_v31, %v3917_v14 }
 0x34e   : > { %v4577_v33 = vpop.eup %4576  ;;  %v3030_v36 = vmul.f32 %v4575_v32, %v3919_v15 }
 0x34f   : > { %v4579_v35 = vpop.eup %4578  ;;  %v3029_v37 = vmul.f32 %v4577_v33, %v3918_v18  ;;  %v3032_v41 = vpack.c.bf16 %v3028_v34, %v3028_v34 }
 0x350   : > { %v3031_v38 = vmul.f32 %v4579_v35, %v3920_v19  ;;  %v3034_v43 = vpack.c.bf16 %v3030_v36, %v3030_v36 }
 0x351   : > { %v3033_v40 = vpack.c.bf16 %v3029_v37, %v3029_v37 }
 0x352   : > { %v3035_v42 = vpack.c.bf16 %v3031_v38, %v3031_v38 }
 0x353   : > { %3331 = vmatprep.mubr.bf16.mxu0 %v3033_v40 }
 0x354   : > { %3371 = vmatprep.mubr.bf16.mxu1 %v3035_v42  ;;  %3332 = vmatmul.mubr.bf16.vlgmr.msra.gmra.mrb[8].mxu0 %v3032_v41 }
 0x355   : > { %3372 = vmatmul.mubr.bf16.vlgmr.msra.gmra.mrb[8].mxu1 %v3034_v43 }
 0x427   : > { %v3885_v44 = vpop.f32.mrb[8].mxu0 }
 0x428   : > { %v3907_v45 = vpop.f32.mrb[8].mxu1  ;;  %v3886_v47 = vpop.f32.mrb[9].mxu0 }
 0x429   : > { %v3887_v48 = vadd.f32 %v3886_v47, %v3885_v44  ;;  %v3908_v49 = vpop.f32.mrb[9].mxu1  ;;  %v3888_v55 = vpop.f32.mrb[10].mxu0 }
 0x42a   : > { %v3909_v56 = vadd.f32 %v3908_v49, %v3907_v45  ;;  %v3910_v57 = vpop.f32.mrb[10].mxu1  ;;  %v3889_v58 = vpop.f32.mrb[11].mxu0 }
 0x42b   : > { %v3334_v52 = vadd.f32 %v3887_v48, %v3833_v46  ;;  %v3911_v60 = vpop.f32.mrb[11].mxu1 }
 0x42d   : > { %v3374_v61 = vadd.f32 %v3909_v56, %v3334_v52 }
 0x42f   : > { %3379 = vst [vmem:[%s308_s26] sm:$0xff] %v3374_v61  ;;  %v3380_v62 = vmul.f32 0.5, %v3374_v61 }
 0x431   : > { %v3381_v63 = vmul.f32 1.442695, %v3380_v62 }
 0x433   : > { %4580 = vpow2.f32 %v3381_v63 }
 0x43d   : > { %v4581_v59 = vpop.eup %4580 }
 0x43e   : > { %3383 = vst [vmem:[%s308_s26 + $0x8] sm:$0xff] %v4581_v59 }
 0x43f PF: > { %s19_s24 = sadd.s32 1, %s4652_s24  }
 0x440   : > { %p16_p9 = scmp.ge.s32.totalorder %s19_s24, 4  }
 0x442   :  { %18 = sbr.rel (!%p16_p9) target bundleno = 2 (0x2), region = 87 }
 0x449   :  { %3405 = vsyncpa [#allocation3], 1 }
 0x44a   :  { %3407 = vsyncpa [#allocation3 + $0x1], 1 }
 0x44b   :  { %3408 = vsyncpa [#allocation5], 1 }

</bundles_post_ra>
